<compile_context>
chip_gen: v7x
topology: tpu7x:2x2x1
jax: 0.10.0
libtpu: 0.0.40
codegen_flags: <defaults>
</compile_context>

<pallas_src>
import math

import jax
import jax.numpy as jnp
from jax.experimental import pallas as pl
from jax.experimental.pallas import tpu as pltpu


def losnet_kernel(x2_ref, w1bd_ref, b1t_ref, w2bd_ref, b2_ref, o_ref, h_ref):
    # x2_ref : (nb, S*F)   each row packs S consecutive samples (F feats each)
    # w1bd_ref: (S*F, S*H) block-diagonal kron(I_S, W1^T), resident
    # b1t_ref : (1, S*H)   b1 tiled S times
    # w2bd_ref: (S*H, S)   block-diagonal kron(I_S, W2^T), resident
    # b2_ref  : (1, 1)     scalar bias in SMEM
    # o_ref   : (nb, S)    S outputs per row
    # h_ref   : (nb, S*H)  f32 VMEM scratch for the hidden activations
    #
    # Layer 1 on the MXU: because W1bd is block-diagonal, this single matmul
    # equals the per-sample (F,)@(F,H) Linear1 for all S samples of every row,
    # with the batch packed along lanes and no transpose of x anywhere.
    h_ref[...] = jnp.dot(x2_ref[...], w1bd_ref[...],
                         preferred_element_type=jnp.float32)
    # Bias + ReLU on the VPU (b1t broadcasts over rows).
    h_ref[...] = jnp.maximum(h_ref[...] + b1t_ref[...], 0.0)
    # Layer 2 on the MXU: W2bd performs the grouped (H -> 1) reduction for
    # each of the S samples in a row.
    y = jnp.dot(h_ref[...], w2bd_ref[...], preferred_element_type=jnp.float32)
    o_ref[...] = (y + b2_ref[0, 0]).astype(o_ref.dtype)


def losnet_forward(x, w1, b1, w2, b2, *, samples_per_block=16384):
    """losnet forward pass: Linear(F->20) -> ReLU -> Linear(20->1).

    Args (PyTorch-native layouts):
      x : (B, F) float32
      w1: (H, F)  Linear1.weight      b1: (H,)  Linear1.bias
      w2: (1, H)  Linear3.weight      b2: (1,)  Linear3.bias
    Returns:
      (B, 1) float32
    """
    B, F = x.shape
    H = w1.shape[0]

    # Fold S consecutive samples into each row so S*F is lane-aligned
    # (multiple of 128).  For F=12 this gives S=32, S*F=384.  The reshape of
    # a row-major (B, F) array is free -- no data movement.
    S = 128 // math.gcd(F, 128)
    SF, SH = S * F, S * H

    B_pad = ((B + S - 1) // S) * S
    if B_pad != B:
        # Slow path: only when B is not a multiple of S (costs one extra HBM
        # pass over x).  Callers that control the batch should keep B % S == 0.
        x = jnp.pad(x, ((0, B_pad - B), (0, 0)))
    nrows = B_pad // S
    x2 = x.reshape(nrows, SF)                         # free row-major reshape

    # Row block: ~samples_per_block samples per grid step amortizes the fixed
    # per-step overhead; ragged last block handled by the cdiv grid (no pad).
    if nrows >= 8:
        tgt = max(8, (samples_per_block // S) // 8 * 8)
        nb = min(tgt, (nrows // 8) * 8)
    else:
        nb = nrows
    grid = pl.cdiv(nrows, nb)

    # Block-diagonal weights kron(I_S, W^T): tiny (<1 MiB f32), built once per
    # call, resident in VMEM across all grid steps.
    f32 = jnp.float32
    eye_s = jnp.eye(S, dtype=f32)
    w1bd = jnp.kron(eye_s, w1.astype(f32).T)          # (S*F, S*H)
    w2bd = jnp.kron(eye_s, w2.astype(f32).T)          # (S*H, S)
    b1t = jnp.tile(b1.astype(f32), S).reshape(1, SH)  # (1, S*H)
    b2s = b2.reshape(1, 1).astype(f32)                # scalar -> SMEM

    # VMEM budget: double-buffered x / out blocks + resident weights + the
    # hidden-activation scratch, with headroom for compiler spill space.
    vmem_est = (2 * nb * SF * 4
                + 2 * nb * max(S, 128) * 4
                + 2 * (SF * SH + 8 * SH + SH * 128) * 4
                + nb * SH * 4)
    vmem_limit = int(min(max(int(vmem_est * 1.5), 16 * 1024 * 1024),
                         48 * 1024 * 1024))

    out2 = pl.pallas_call(
        losnet_kernel,
        out_shape=jax.ShapeDtypeStruct((nrows, S), x.dtype),
        grid_spec=pltpu.PrefetchScalarGridSpec(
            num_scalar_prefetch=0,
            grid=(grid,),
            in_specs=[
                pl.BlockSpec((nb, SF), lambda i: (i, 0)),    # x rows (streamed)
                pl.BlockSpec((SF, SH), lambda i: (0, 0)),    # W1 block-diag
                pl.BlockSpec((1, SH), lambda i: (0, 0)),     # b1 tiled
                pl.BlockSpec((SH, S), lambda i: (0, 0)),     # W2 block-diag
                pl.BlockSpec(memory_space=pltpu.MemorySpace.SMEM),  # b2 scalar
            ],
            out_specs=pl.BlockSpec((nb, S), lambda i: (i, 0)),
            scratch_shapes=[pltpu.VMEM((nb, SH), jnp.float32)],
        ),
        compiler_params=pltpu.CompilerParams(
            # Batch-row grid axis is independent -> shards across the 2 TCs
            # on v7x; it is also the only axis, so no reduction concerns.
            dimension_semantics=("parallel",),
            vmem_limit_bytes=vmem_limit,
        ),
    )(x2, w1bd, b1t, w2bd, b2s)

    # (nrows, S) -> (B_pad, 1) is again a free row-major reshape; drop any
    # padded tail rows (their values are finite garbage and never reduced).
    return out2.reshape(B_pad, 1)[:B]


def init_params(key, features_num, hidden=20):
    # Deterministic init mimicking PyTorch nn.Linear defaults:
    # U(-1/sqrt(fan_in), 1/sqrt(fan_in)) for weights and biases.
    k1, k2, k3, k4 = jax.random.split(key, 4)
    bound1 = 1.0 / math.sqrt(features_num)
    w1 = jax.random.uniform(k1, (hidden, features_num), jnp.float32,
                            -bound1, bound1)
    b1 = jax.random.uniform(k2, (hidden,), jnp.float32, -bound1, bound1)
    bound2 = 1.0 / math.sqrt(hidden)
    w2 = jax.random.uniform(k3, (1, hidden), jnp.float32, -bound2, bound2)
    b2 = jax.random.uniform(k4, (1,), jnp.float32, -bound2, bound2)
    return w1, b1, w2, b2


if __name__ == "__main__":
    key = jax.random.PRNGKey(0)
    kx1, kx2, kx3, kp = jax.random.split(key, 4)

    F, H = 12, 20
    w1, b1, w2, b2 = init_params(kp, F, H)

    fwd = jax.jit(losnet_forward)

    def ref_fn(x):
        return jnp.maximum(x @ w1.T + b1, 0.0) @ w2.T + b2

    # Three small batches exercise: single block (256), free-reshape fast path
    # with a ragged last grid block (320), and the B % S != 0 pad fallback (456).
    cases = (("single", 256, kx1), ("ragged_grid", 320, kx2),
             ("pad_path", 456, kx3))
    for name, B, kx in cases:
        x = jax.random.normal(kx, (B, F), jnp.float32)
        out = jax.block_until_ready(fwd(x, w1, b1, w2, b2))
        ref = ref_fn(x)
        assert out.shape == (B, 1), (name, out.shape)
        err = float(jnp.max(jnp.abs(out - ref)))
        # Tolerance covers the MXU's bf16-pass matmul rounding on all TPU
        # generations (typically ~1e-5 observed with multi-pass f32 matmuls).
        assert err < 1e-2, (name, err)

    print("KERNEL_OK")
</pallas_src>

<mosaic_0001>
module attributes {stable_mosaic.version = 11 : i64} {
  func.func @losnet_kernel(%arg0: i32, %arg1: memref<8x384xf32, #tpu.memory_space<vmem>>, %arg2: memref<384x640xf32, #tpu.memory_space<vmem>>, %arg3: memref<1x640xf32, #tpu.memory_space<vmem>>, %arg4: memref<640x32xf32, #tpu.memory_space<vmem>>, %arg5: memref<1x1xf32, #tpu.memory_space<smem>>, %arg6: memref<8x32xf32, #tpu.memory_space<vmem>>, %arg7: memref<8x640xf32, #tpu.memory_space<vmem>>) attributes {dimension_semantics = [#tpu.dimension_semantics<parallel>], iteration_bounds = array<i64: 1>, scalar_prefetch = 0 : i64, scratch_operands = 1 : i64, tpu.core_type = #tpu.core_type<tc>, window_params = [{transform_indices = @transform_0, window_bounds = array<i64: 8, 384>}, {pipeline_mode = #tpu.pipeline_mode<synchronous>, transform_indices = @transform_1, window_bounds = array<i64: 384, 640>}, {pipeline_mode = #tpu.pipeline_mode<synchronous>, transform_indices = @transform_2, window_bounds = array<i64: 1, 640>}, {pipeline_mode = #tpu.pipeline_mode<synchronous>, transform_indices = @transform_3, window_bounds = array<i64: 640, 32>}, {transform_indices = @transform_4, window_bounds = array<i64: 1, 1>}, {transform_indices = @transform_5, window_bounds = array<i64: 8, 32>}]} {
    %c0 = arith.constant 0 : index
    %c0_0 = arith.constant 0 : index
    %0 = vector.load %arg1[%c0, %c0_0] : memref<8x384xf32, #tpu.memory_space<vmem>>, vector<8x384xf32>
    %c0_1 = arith.constant 0 : index
    %c0_2 = arith.constant 0 : index
    %1 = vector.load %arg2[%c0_1, %c0_2] : memref<384x640xf32, #tpu.memory_space<vmem>>, vector<384x640xf32>
    %cst = arith.constant dense<0.000000e+00> : vector<8x640xf32>
    %2 = tpu.matmul %0, %1, %cst {dimension_numbers = #tpu.dot_dimension_numbers<[1], [0], [0], [1], [0, 0, 1, 1], [], []>} : vector<8x384xf32>, vector<384x640xf32>, vector<8x640xf32> -> vector<8x640xf32>
    %c0_3 = arith.constant 0 : index
    %c0_4 = arith.constant 0 : index
    %3 = vector.load %arg7[%c0_3, %c0_4] : memref<8x640xf32, #tpu.memory_space<vmem>>, vector<8x640xf32>
    tpu.vector_store %arg7[%c0_3, %c0_4], %2 {strides = array<i32>} : memref<8x640xf32, #tpu.memory_space<vmem>>, vector<8x640xf32>,
    %c0_5 = arith.constant 0 : index
    %c0_6 = arith.constant 0 : index
    %4 = vector.load %arg7[%c0_5, %c0_6] : memref<8x640xf32, #tpu.memory_space<vmem>>, vector<8x640xf32>
    %c0_7 = arith.constant 0 : index
    %c0_8 = arith.constant 0 : index
    %5 = vector.load %arg3[%c0_7, %c0_8] : memref<1x640xf32, #tpu.memory_space<vmem>>, vector<1x640xf32>
    %6 = vector.broadcast %5 : vector<1x640xf32> to vector<8x640xf32>
    %7 = arith.addf %4, %6 : vector<8x640xf32>
    %cst_9 = arith.constant 0.000000e+00 : f32
    %8 = vector.broadcast %cst_9 : f32 to vector<8x640xf32>
    %9 = arith.maximumf %7, %8 : vector<8x640xf32>
    %c0_10 = arith.constant 0 : index
    %c0_11 = arith.constant 0 : index
    %10 = vector.load %arg7[%c0_10, %c0_11] : memref<8x640xf32, #tpu.memory_space<vmem>>, vector<8x640xf32>
    tpu.vector_store %arg7[%c0_10, %c0_11], %9 {strides = array<i32>} : memref<8x640xf32, #tpu.memory_space<vmem>>, vector<8x640xf32>,
    %c0_12 = arith.constant 0 : index
    %c0_13 = arith.constant 0 : index
    %11 = vector.load %arg7[%c0_12, %c0_13] : memref<8x640xf32, #tpu.memory_space<vmem>>, vector<8x640xf32>
    %c0_14 = arith.constant 0 : index
    %c0_15 = arith.constant 0 : index
    %12 = vector.load %arg4[%c0_14, %c0_15] : memref<640x32xf32, #tpu.memory_space<vmem>>, vector<640x32xf32>
    %cst_16 = arith.constant dense<0.000000e+00> : vector<8x32xf32>
    %13 = tpu.matmul %11, %12, %cst_16 {dimension_numbers = #tpu.dot_dimension_numbers<[1], [0], [0], [1], [0, 0, 1, 1], [], []>} : vector<8x640xf32>, vector<640x32xf32>, vector<8x32xf32> -> vector<8x32xf32>
    %c0_17 = arith.constant 0 : index
    %c0_18 = arith.constant 0 : index
    %14 = memref.load %arg5[%c0_17, %c0_18] : memref<1x1xf32, #tpu.memory_space<smem>>
    %15 = vector.broadcast %14 : f32 to vector<8x32xf32>
    %16 = arith.addf %13, %15 : vector<8x32xf32>
    %c0_19 = arith.constant 0 : index
    %c0_20 = arith.constant 0 : index
    %17 = vector.load %arg6[%c0_19, %c0_20] : memref<8x32xf32, #tpu.memory_space<vmem>>, vector<8x32xf32>
    tpu.vector_store %arg6[%c0_19, %c0_20], %16 {strides = array<i32>} : memref<8x32xf32, #tpu.memory_space<vmem>>, vector<8x32xf32>,
    return
  }
  func.func @transform_0(%arg0: i32) -> (i32, i32) {
    %c0_i32 = arith.constant 0 : i32
    %c0_i32_0 = arith.constant 0 : i32
    return %arg0, %c0_i32 : i32, i32
  }
  func.func @transform_1(%arg0: i32) -> (i32, i32) {
    %c0_i32 = arith.constant 0 : i32
    %c0_i32_0 = arith.constant 0 : i32
    %c0_i32_1 = arith.constant 0 : i32
    return %c0_i32, %c0_i32_0 : i32, i32
  }
  func.func @transform_2(%arg0: i32) -> (i32, i32) {
    %c0_i32 = arith.constant 0 : i32
    %c0_i32_0 = arith.constant 0 : i32
    %c0_i32_1 = arith.constant 0 : i32
    return %c0_i32, %c0_i32_0 : i32, i32
  }
  func.func @transform_3(%arg0: i32) -> (i32, i32) {
    %c0_i32 = arith.constant 0 : i32
    %c0_i32_0 = arith.constant 0 : i32
    %c0_i32_1 = arith.constant 0 : i32
    return %c0_i32, %c0_i32_0 : i32, i32
  }
  func.func @transform_4(%arg0: i32) -> (i32, i32) {
    %c0_i32 = arith.constant 0 : i32
    %c0_i32_0 = arith.constant 0 : i32
    %c0_i32_1 = arith.constant 0 : i32
    return %c0_i32, %c0_i32_0 : i32, i32
  }
  func.func @transform_5(%arg0: i32) -> (i32, i32) {
    %c0_i32 = arith.constant 0 : i32
    %c0_i32_0 = arith.constant 0 : i32
    return %arg0, %c0_i32 : i32, i32
  }
}

</mosaic_0001>

<bundles_post_ra>
// kernel: tile.9
= control target key start
LH: loop header
LB: loop body
LE: loop exit
PB: predicated region body
PF: predicated region fallthrough
CT: control target
= control target key end

     0   :  { %vm9_vm0 = vcmask 31744   ;;  %vm27_vm1 = vcmask 97280   ;;  %s346_s14 = smov 124   ;;  %vm23_vm2 = vcmask 64512   ;;  %s347_s19 = smov 116   ;;  %vm13_vm3 = vcmask 130048   ;;  %s518_s0 = inlined_call_operand.vmem [shape: f32[32,20], index: 0, kind: input, shape index: {}]   ;;  %s519_s1 = inlined_call_operand.vmem [shape: f32[1,640], index: 1, kind: output, shape index: {}]  }
   0x1   :  { %v276_v0 = vld [vmem:[%s518_s0 + $0x13] sm:$0x1]   ;;  %v280_v3 = vld [vmem:[%s518_s0 + $0x19] sm:$0x1]   ;;  %v278_v6 = vld [vmem:[%s518_s0 + $0x6] sm:$0x1]  }
   0x2   :  { %v277_v1 = vld [vmem:[%s518_s0 + $0x13] sm:$0x1]   ;;  %v281_v4 = vld [vmem:[%s518_s0 + $0x19] sm:$0x1]   ;;  %v279_v7 = vld [vmem:[%s518_s0 + $0x6] sm:$0x1]  }
   0x3   :  { %v10_v2 = vsel %vm9_vm0, %v277_v1, %v276_v0  ;;  %v37_v5 = vsel %vm27_vm1, %v281_v4, %v280_v3  ;;  %v24_v8 = vsel %vm23_vm2, %v279_v7, %v278_v6  ;;  %v282_v9 = vld [vmem:[%s518_s0 + $0xc] sm:$0x1]   ;;  %s348_s24 = smov 120   ;;  %s349_s25 = smov 112   ;;  %v284_v12 = vld [vmem:[%s518_s0 + $0x1f] sm:$0x1]  }
   0x4   :  { %11 = vrot.lane.b32.xlu0 %v10_v2, %s346_s14  ;;  %38 = vrot.lane.b32.xlu1 %v37_v5, %s347_s19  ;;  %v283_v10 = vld [vmem:[%s518_s0 + $0xc] sm:$0x1]   ;;  %v285_v13 = vld [vmem:[%s518_s0 + $0x12] sm:$0x1]   ;;  %s350_s30 = smov 108   ;;  %s351_s2 = smov 104  }
   0x5   :  { %v51_v11 = vsel %vm13_vm3, %v283_v10, %v282_v9  ;;  %v286_v14 = vld [vmem:[%s518_s0 + $0x5] sm:$0x1]   ;;  %v287_v15 = vld [vmem:[%s518_s0 + $0x18] sm:$0x1]   ;;  %s352_s7 = smov 100   ;;  %s353_s8 = smov 96  }
   0x6   :  { %v288_v16 = vld [vmem:[%s518_s0 + $0xb] sm:$0x1]   ;;  %v289_v17 = vld [vmem:[%s518_s0 + $0x1e] sm:$0x1]   ;;  %s354_s13 = smov 92   ;;  %vm3_vm4 = vcmask 162816  }
   0x7   :  { %v2_v18 = vld [vmem:[%s518_s0] sm:$0x1]   ;;  %s355_s16 = smov 88   ;;  %v290_v19 = vld [vmem:[%s518_s0 + $0x11] sm:$0x1]   ;;  %s356_s21 = smov 84  }
   0x8   :  { %25 = vrot.lane.b32.xlu0 %v24_v8, %s348_s24  ;;  %52 = vrot.lane.b32.xlu1 %v51_v11, %s349_s25  ;;  %4 = vst.msk [vmem:[#allocation0] sm:$0x1] %vm3_vm4, %v2_v18   ;;  %v291_v20 = vld [vmem:[%s518_s0 + $0x4] sm:$0x1]   ;;  %s357_s22 = smov 80   ;;  %s358_s27 = smov 76  }
   0x9   :  { %v292_v21 = vld [vmem:[%s518_s0 + $0x17] sm:$0x1]   ;;  %v293_v22 = vld [vmem:[%s518_s0 + $0xa] sm:$0x1]   ;;  %s359_s28 = smov 72   ;;  %s360_s4 = smov 68  }
   0xa   :  { %v294_v23 = vld [vmem:[%s518_s0 + $0x1d] sm:$0x1]   ;;  %v295_v24 = vld [vmem:[%s518_s0 + $0x10] sm:$0x1]   ;;  %s361_s5 = smov 64   ;;  %s362_s10 = smov 60  }
   0xb   :  { %v296_v25 = vld [vmem:[%s518_s0 + $0x3] sm:$0x1]   ;;  %v297_v26 = vld [vmem:[%s518_s0 + $0x16] sm:$0x1]   ;;  %s363_s11 = smov 56   ;;  %s365_s17 = smov 48  }
   0xc   :  { %62 = vrot.lane.b32.xlu0 %v284_v12, %s350_s30  ;;  %69 = vrot.lane.b32.xlu1 %v285_v13, %s351_s2  ;;  %v298_v27 = vld [vmem:[%s518_s0 + $0x9] sm:$0x1]   ;;  %v299_v28 = vld [vmem:[%s518_s0 + $0x1c] sm:$0x1]   ;;  %s367_s23 = smov 40   ;;  %s369_s29 = smov 32  }
   0xd   :  { %v300_v29 = vld [vmem:[%s518_s0 + $0xf] sm:$0x1]   ;;  %v301_v30 = vld [vmem:[%s518_s0 + $0x2] sm:$0x1]   ;;  %v302_v31 = vld [vmem:[%s518_s0 + $0x15] sm:$0x1]  }
   0xe   :  { %v303_v32 = vld [vmem:[%s518_s0 + $0x8] sm:$0x1]   ;;  %v304_v33 = vld [vmem:[%s518_s0 + $0x1b] sm:$0x1]   ;;  %v305_v34 = vld [vmem:[%s518_s0 + $0xe] sm:$0x1]  }
   0xf   :  { %s371_s6 = smov 24   ;;  %v306_v35 = vld [vmem:[%s518_s0 + $0x1] sm:$0x1]   ;;  %v307_v36 = vld [vmem:[%s518_s0 + $0x14] sm:$0x1]   ;;  %s373_s12 = smov 16  }
  0x10   :  { %76 = vrot.lane.b32.xlu0 %v286_v14, %s352_s7  ;;  %82 = vrot.lane.b32.xlu1 %v287_v15, %s353_s8  ;;  %v308_v37 = vld [vmem:[%s518_s0 + $0x7] sm:$0x1]   ;;  %v309_v38 = vld [vmem:[%s518_s0 + $0x1a] sm:$0x1]   ;;  %s375_s18 = smov 8   ;;  %vm16_vm5 = vcmask 1048544  }
  0x11   :  { %v310_v39 = vld [vmem:[%s518_s0 + $0xd] sm:$0x1]   ;;  %s376_s0 = smov 4   ;;  %vm43_vm6 = vcmask 1048480   ;;  %vm30_vm7 = vcmask 1048512   ;;  %vm57_vm8 = vcmask 1048448  }
  0x12   :  { %vm64_vm9 = vcmask 1048416   ;;  %vm71_vm10 = vcmask 1015616   ;;  %vm78_vm11 = vcmask 982816   ;;  %vm84_vm12 = vcmask 950016  }
  0x13   :  { %vm91_vm13 = vcmask 917216   ;;  %vm98_vm14 = vcmask 884416   ;;  %vm105_vm15 = vcmask 851616   ;;  %vm139_vm4 = vcmask 687616  }
  0x14   :  { %89 = vrot.lane.b32.xlu0 %v288_v16, %s354_s13  ;;  %96 = vrot.lane.b32.xlu1 %v289_v17, %s355_s16  ;;  %s364_s16 = smov 52  }
  0x18   :  { %103 = vrot.lane.b32.xlu0 %v290_v19, %s356_s21  ;;  %110 = vrot.lane.b32.xlu1 %v291_v20, %s357_s22  ;;  %s366_s22 = smov 44  }
  0x1c   :  { %116 = vrot.lane.b32.xlu0 %v292_v21, %s358_s27  ;;  %123 = vrot.lane.b32.xlu1 %v293_v22, %s359_s28  ;;  %s368_s28 = smov 36  }
  0x20   :  { %130 = vrot.lane.b32.xlu0 %v294_v23, %s360_s4  ;;  %137 = vrot.lane.b32.xlu1 %v295_v24, %s361_s5  ;;  %s370_s5 = smov 28  }
  0x24   :  { %144 = vrot.lane.b32.xlu0 %v296_v25, %s362_s10  ;;  %150 = vrot.lane.b32.xlu1 %v297_v26, %s363_s11  ;;  %s372_s11 = smov 20  }
  0x28   :  { %157 = vrot.lane.b32.xlu0 %v298_v27, %s364_s16  ;;  %164 = vrot.lane.b32.xlu1 %v299_v28, %s365_s17  ;;  %s374_s17 = smov 12  }
  0x2c   :  { %171 = vrot.lane.b32.xlu0 %v300_v29, %s366_s22  ;;  %178 = vrot.lane.b32.xlu1 %v301_v30, %s367_s23 }
  0x30   :  { %184 = vrot.lane.b32.xlu0 %v302_v31, %s368_s28  ;;  %191 = vrot.lane.b32.xlu1 %v303_v32, %s369_s29 }
  0x34   :  { %198 = vrot.lane.b32.xlu0 %v304_v33, %s370_s5  ;;  %205 = vrot.lane.b32.xlu1 %v305_v34, %s371_s6 }
  0x38   :  { %212 = vrot.lane.b32.xlu0 %v306_v35, %s372_s11  ;;  %218 = vrot.lane.b32.xlu1 %v307_v36, %s373_s12 }
  0x3c   :  { %225 = vrot.lane.b32.xlu0 %v308_v37, %s374_s17  ;;  %232 = vrot.lane.b32.xlu1 %v309_v38, %s375_s18 }
  0x40   :  { %239 = vrot.lane.b32.xlu0 %v310_v39, %s376_s0 }
  0x76   :  { %v12_v40 = vpop.permute.xlu0 %11   ;;  %v39_v41 = vpop.permute.xlu1 %38  }
  0x77   :  { %15 = vst.msk [vmem:[#allocation0 + $0x18] sm:$0x1] %vm13_vm3, %v12_v40   ;;  %vm132_vm3 = vcmask 720416  }
  0x78   :  { %18 = vst.msk [vmem:[#allocation0 + $0x10] sm:$0x1] %vm16_vm5, %v12_v40   ;;  %vm146_vm5 = vcmask 654816  }
  0x79   :  { %42 = vst.msk [vmem:[#allocation0 + $0x20] sm:$0x1] %vm23_vm2, %v39_v41   ;;  %vm125_vm2 = vcmask 753216  }
  0x7a   :  { %45 = vst.msk [vmem:[#allocation0 + $0x18] sm:$0x1] %vm43_vm6, %v39_v41   ;;  %v26_v42 = vpop.permute.xlu0 %25   ;;  %v53_v43 = vpop.permute.xlu1 %52   ;;  %vm152_vm6 = vcmask 622016  }
  0x7b   :  { %29 = vst.msk [vmem:[#allocation0 + $0x8] sm:$0x1] %vm27_vm1, %v26_v42   ;;  %vm118_vm1 = vcmask 786016  }
  0x7c   :  { %31 = vst.msk [vmem:[#allocation0] sm:$0x1] %vm30_vm7, %v26_v42   ;;  %vm159_vm7 = vcmask 589216  }
  0x7d   :  { %56 = vst.msk [vmem:[#allocation0 + $0x10] sm:$0x1] %vm9_vm0, %v53_v43   ;;  %vm112_vm0 = vcmask 818816  }
  0x7e   :  { %59 = vst.msk [vmem:[#allocation0 + $0x8] sm:$0x1] %vm57_vm8, %v53_v43   ;;  %v63_v44 = vpop.permute.xlu0 %62   ;;  %v70_v45 = vpop.permute.xlu1 %69   ;;  %vm166_vm8 = vcmask 556416  }
  0x7f   :  { %66 = vst.msk [vmem:[#allocation0 + $0x20] sm:$0x1] %vm64_vm9, %v63_v44   ;;  %vm173_vm9 = vcmask 523616  }
  0x80   :  { %73 = vst.msk [vmem:[#allocation0 + $0x10] sm:$0x1] %vm71_vm10, %v70_v45   ;;  %vm180_vm10 = vcmask 490816  }
  0x82   :  { %v77_v46 = vpop.permute.xlu0 %76   ;;  %v83_v47 = vpop.permute.xlu1 %82  }
  0x83   :  { %79 = vst.msk [vmem:[#allocation0] sm:$0x1] %vm78_vm11, %v77_v46   ;;  %vm186_vm11 = vcmask 458016  }
  0x84   :  { %86 = vst.msk [vmem:[#allocation0 + $0x18] sm:$0x1] %vm84_vm12, %v83_v47   ;;  %vm193_vm12 = vcmask 425216  }
  0x86   :  { %v90_v48 = vpop.permute.xlu0 %89   ;;  %v97_v49 = vpop.permute.xlu1 %96  }
  0x87   :  { %93 = vst.msk [vmem:[#allocation0 + $0x8] sm:$0x1] %vm91_vm13, %v90_v48   ;;  %vm200_vm13 = vcmask 392416  }
  0x88   :  { %100 = vst.msk [vmem:[#allocation0 + $0x20] sm:$0x1] %vm98_vm14, %v97_v49   ;;  %vm207_vm14 = vcmask 359616  }
  0x8a   :  { %v104_v50 = vpop.permute.xlu0 %103   ;;  %v111_v51 = vpop.permute.xlu1 %110  }
  0x8b   :  { %107 = vst.msk [vmem:[#allocation0 + $0x10] sm:$0x1] %vm105_vm15, %v104_v50   ;;  %vm214_vm15 = vcmask 326816  }
  0x8c   :  { %113 = vst.msk [vmem:[#allocation0] sm:$0x1] %vm112_vm0, %v111_v51   ;;  %vm220_vm0 = vcmask 294016  }
  0x8e   :  { %v117_v52 = vpop.permute.xlu0 %116   ;;  %v124_v53 = vpop.permute.xlu1 %123  }
  0x8f   :  { %120 = vst.msk [vmem:[#allocation0 + $0x18] sm:$0x1] %vm118_vm1, %v117_v52   ;;  %vm227_vm1 = vcmask 261216  }
  0x90   :  { %127 = vst.msk [vmem:[#allocation0 + $0x8] sm:$0x1] %vm125_vm2, %v124_v53   ;;  %vm234_vm2 = vcmask 228416  }
  0x92   :  { %v131_v54 = vpop.permute.xlu0 %130   ;;  %v138_v55 = vpop.permute.xlu1 %137  }
  0x93   :  { %134 = vst.msk [vmem:[#allocation0 + $0x20] sm:$0x1] %vm132_vm3, %v131_v54   ;;  %vm241_vm3 = vcmask 195616  }
  0x94   :  { %141 = vst.msk [vmem:[#allocation0 + $0x10] sm:$0x1] %vm139_vm4, %v138_v55  }
  0x96   :  { %v145_v56 = vpop.permute.xlu0 %144   ;;  %v151_v57 = vpop.permute.xlu1 %150  }
  0x97   :  { %147 = vst.msk [vmem:[#allocation0] sm:$0x1] %vm146_vm5, %v145_v56  }
  0x98   :  { %154 = vst.msk [vmem:[#allocation0 + $0x18] sm:$0x1] %vm152_vm6, %v151_v57  }
  0x9a   :  { %v158_v58 = vpop.permute.xlu0 %157   ;;  %v165_v59 = vpop.permute.xlu1 %164  }
  0x9b   :  { %161 = vst.msk [vmem:[#allocation0 + $0x8] sm:$0x1] %vm159_vm7, %v158_v58  }
  0x9c   :  { %168 = vst.msk [vmem:[#allocation0 + $0x20] sm:$0x1] %vm166_vm8, %v165_v59  }
  0x9e   :  { %v172_v60 = vpop.permute.xlu0 %171   ;;  %v179_v61 = vpop.permute.xlu1 %178  }
  0x9f   :  { %175 = vst.msk [vmem:[#allocation0 + $0x10] sm:$0x1] %vm173_vm9, %v172_v60  }
  0xa0   :  { %181 = vst.msk [vmem:[#allocation0] sm:$0x1] %vm180_vm10, %v179_v61  }
  0xa2   :  { %v185_v62 = vpop.permute.xlu0 %184   ;;  %v192_v63 = vpop.permute.xlu1 %191  }
  0xa3   :  { %188 = vst.msk [vmem:[#allocation0 + $0x18] sm:$0x1] %vm186_vm11, %v185_v62  }
  0xa4   :  { %195 = vst.msk [vmem:[#allocation0 + $0x8] sm:$0x1] %vm193_vm12, %v192_v63  }
  0xa6   :  { %v199_v0 = vpop.permute.xlu0 %198   ;;  %v206_v1 = vpop.permute.xlu1 %205  }
  0xa7   :  { %202 = vst.msk [vmem:[#allocation0 + $0x20] sm:$0x1] %vm200_vm13, %v199_v0  }
  0xa8   :  { %209 = vst.msk [vmem:[#allocation0 + $0x10] sm:$0x1] %vm207_vm14, %v206_v1  }
  0xaa   :  { %v213_v2 = vpop.permute.xlu0 %212   ;;  %v219_v3 = vpop.permute.xlu1 %218  }
  0xab   :  { %215 = vst.msk [vmem:[#allocation0] sm:$0x1] %vm214_vm15, %v213_v2  }
  0xac   :  { %222 = vst.msk [vmem:[#allocation0 + $0x18] sm:$0x1] %vm220_vm0, %v219_v3  }
  0xae   :  { %v226_v4 = vpop.permute.xlu0 %225   ;;  %v233_v5 = vpop.permute.xlu1 %232  }
  0xaf   :  { %229 = vst.msk [vmem:[#allocation0 + $0x8] sm:$0x1] %vm227_vm1, %v226_v4  }
  0xb0   :  { %236 = vst.msk [vmem:[#allocation0 + $0x20] sm:$0x1] %vm234_vm2, %v233_v5  }
  0xb2   :  { %v247_v6 = vld [vmem:[#allocation0] sm:$0x1]  ;;  %v240_v7 = vpop.permute.xlu0 %239  }
  0xb3   :  { %249 = vst [vmem:[%s519_s1] sm:$0x1] %v247_v6  ;;  %v262_v8 = vld [vmem:[#allocation0 + $0x18] sm:$0x1]  ;;  %243 = vst.msk [vmem:[#allocation0 + $0x10] sm:$0x1] %vm241_vm3, %v240_v7  }
  0xb4   :  { %313 = vst [vmem:[%s519_s1 + $0x3] sm:$0x1] %v262_v8 }
  0xb6   :  { %v251_v9 = vld [vmem:[#allocation0 + $0x8] sm:$0x1] }
  0xb7   :  { %311 = vst [vmem:[%s519_s1 + $0x1] sm:$0x1] %v251_v9  ;;  %v268_v10 = vld [vmem:[#allocation0 + $0x20] sm:$0x1] }
  0xb8   :  { %314 = vst [vmem:[%s519_s1 + $0x4] sm:$0x1] %v268_v10 }
  0xba   :  { %v256_v11 = vld [vmem:[#allocation0 + $0x10] sm:$0x1] }
  0xbb   :  { %312 = vst [vmem:[%s519_s1 + $0x2] sm:$0x1] %v256_v11 }

// kernel: losnet_forward.1
= control target key start
LH: loop header
LB: loop body
LE: loop exit
PB: predicated region body
PF: predicated region fallthrough
CT: control target
= control target key end

     0   :  { %vm1597_vm0 = vmmov 0   ;;  %vm1037_vm1 = vcmask 261120   ;;  %s2657_s1 = inlined_call_operand.vmem [shape: f32[384,640], index: 1, kind: input, shape index: {}]   ;;  %s2658_s0 = inlined_call_operand.vmem [shape: f32[8,384], index: 0, kind: input, shape index: {}]   ;;  %s2659_s3 = inlined_call_operand.vmem [shape: f32[640,32], index: 3, kind: input, shape index: {}]   ;;  %s2660_s2 = inlined_call_operand.vmem [shape: f32[1,640], index: 2, kind: input, shape index: {}]   ;;  %s2661_s4 = inlined_call_operand.<no memory space> [shape: f32[1,1], index: 4, kind: input, shape index: {}]   ;;  %s2662_s5 = inlined_call_operand.vmem [shape: f32[8,32], index: 5, kind: output, shape index: {}]  }
   0x1   :  { %v25_v0 = vld [vmem:[%s2657_s1 + $0x8] sm:$0xff]  ;;  %v30_v1 = vld [vmem:[%s2657_s1 + $0x30] sm:$0xff]  ;;  %v27_v2 = vld [vmem:[%s2657_s1 + $0x18] sm:$0xff] }
   0x2   :  { %v1252_v3 = vpack.c.bf16 %v30_v1, %v25_v0  ;;  %v32_v4 = vld [vmem:[%s2657_s1 + $0x40] sm:$0xff]  ;;  %v29_v6 = vld [vmem:[%s2657_s1 + $0x28] sm:$0xff]  ;;  %v26_v9 = vld [vmem:[%s2657_s1 + $0x10] sm:$0xff] }
   0x3   :  { %v24_v5 = vld [vmem:[%s2657_s1] sm:$0xff]  ;;  %v1348_v7 = vpack.c.bf16 %v32_v4, %v27_v2  ;;  %v31_v10 = vld [vmem:[%s2657_s1 + $0x38] sm:$0xff]  ;;  %v37_v14 = vld [vmem:[%s2657_s1 + $0x68] sm:$0xff] }
   0x4   :  { %v1254_v8 = vpack.c.bf16 %v29_v6, %v24_v5  ;;  %v35_v11 = vld [vmem:[%s2657_s1 + $0x58] sm:$0xff]  ;;  %1253 = vmatprep.subr.bf16.mxu0 %v1252_v3  ;;  %v1350_v12 = vpack.c.bf16 %v31_v10, %v26_v9  ;;  %v40_v13 = vld [vmem:[%s2657_s1 + $0x80] sm:$0xff]  ;;  %v42_v15 = vld [vmem:[%s2657_s1 + $0x90] sm:$0xff] }
   0x5   :  { %1349 = vmatprep.subr.bf16.mxu1 %v1348_v7  ;;  %v1256_v16 = vpack.c.bf16 %v40_v13, %v35_v11  ;;  %v1352_v17 = vpack.c.bf16 %v42_v15, %v37_v14  ;;  %v34_v18 = vld [vmem:[%s2657_s1 + $0x50] sm:$0xff]  ;;  %v39_v19 = vld [vmem:[%s2657_s1 + $0x78] sm:$0xff]  ;;  %v36_v20 = vld [vmem:[%s2657_s1 + $0x60] sm:$0xff] }
   0x6   :  { %1255 = vmatpush1.bf16.msra.mxu0 %v1254_v8  ;;  %1351 = vmatpush1.bf16.msra.mxu1 %v1350_v12  ;;  %v1258_v21 = vpack.c.bf16 %v39_v19, %v34_v18  ;;  %v41_v22 = vld [vmem:[%s2657_s1 + $0x88] sm:$0xff]  ;;  %v50_v24 = vld [vmem:[%s2657_s1 + $0xd0] sm:$0xff]  ;;  %v47_v27 = vld [vmem:[%s2657_s1 + $0xb8] sm:$0xff] }
   0x7   :  { %v45_v23 = vld [vmem:[%s2657_s1 + $0xa8] sm:$0xff]  ;;  %1257 = vmatprep.subr.bf16.mxu0 %v1256_v16  ;;  %1353 = vmatprep.subr.bf16.mxu1 %v1352_v17  ;;  %v1354_v25 = vpack.c.bf16 %v41_v22, %v36_v20  ;;  %v52_v28 = vld [vmem:[%s2657_s1 + $0xe0] sm:$0xff]  ;;  %v46_v32 = vld [vmem:[%s2657_s1 + $0xb0] sm:$0xff] }
   0x8   :  { %v1260_v26 = vpack.c.bf16 %v50_v24, %v45_v23  ;;  %v44_v29 = vld [vmem:[%s2657_s1 + $0xa0] sm:$0xff]  ;;  %v1356_v30 = vpack.c.bf16 %v52_v28, %v47_v27  ;;  %v49_v31 = vld [vmem:[%s2657_s1 + $0xc8] sm:$0xff]  ;;  %v51_v33 = vld [vmem:[%s2657_s1 + $0xd8] sm:$0xff] }
   0x9   :  { %v1262_v34 = vpack.c.bf16 %v49_v31, %v44_v29  ;;  %v55_v35 = vld [vmem:[%s2657_s1 + $0xf8] sm:$0xff]  ;;  %v60_v36 = vld [vmem:[%s2657_s1 + $0x120] sm:$0xff]  ;;  %v57_v37 = vld [vmem:[%s2657_s1 + $0x108] sm:$0xff]  ;;  %v1358_v38 = vpack.c.bf16 %v51_v33, %v46_v32 }
   0xa   :  { %1259 = vmatpush1.bf16.msra.mxu0 %v1258_v21  ;;  %1355 = vmatpush1.bf16.msra.mxu1 %v1354_v25  ;;  %v1264_v39 = vpack.c.bf16 %v60_v36, %v55_v35  ;;  %v62_v40 = vld [vmem:[%s2657_s1 + $0x130] sm:$0xff]  ;;  %v59_v42 = vld [vmem:[%s2657_s1 + $0x118] sm:$0xff]  ;;  %v56_v44 = vld [vmem:[%s2657_s1 + $0x100] sm:$0xff] }
   0xb   :  { %1261 = vmatprep.subr.bf16.mxu0 %v1260_v26  ;;  %v54_v41 = vld [vmem:[%s2657_s1 + $0xf0] sm:$0xff]  ;;  %1357 = vmatprep.subr.bf16.mxu1 %v1356_v30  ;;  %v1360_v43 = vpack.c.bf16 %v62_v40, %v57_v37  ;;  %v61_v45 = vld [vmem:[%s2657_s1 + $0x128] sm:$0xff]  ;;  %v67_v48 = vld [vmem:[%s2657_s1 + $0x158] sm:$0xff] }
   0xc   :  { %v65_v46 = vld [vmem:[%s2657_s1 + $0x148] sm:$0xff]  ;;  %v70_v47 = vld [vmem:[%s2657_s1 + $0x170] sm:$0xff]  ;;  %v72_v49 = vld [vmem:[%s2657_s1 + $0x180] sm:$0xff]  ;;  %v1266_v50 = vpack.c.bf16 %v59_v42, %v54_v41  ;;  %v1362_v51 = vpack.c.bf16 %v61_v45, %v56_v44 }
   0xd   :  { %v1268_v52 = vpack.c.bf16 %v70_v47, %v65_v46  ;;  %v64_v53 = vld [vmem:[%s2657_s1 + $0x140] sm:$0xff]  ;;  %v69_v54 = vld [vmem:[%s2657_s1 + $0x168] sm:$0xff]  ;;  %v66_v55 = vld [vmem:[%s2657_s1 + $0x150] sm:$0xff]  ;;  %v1364_v56 = vpack.c.bf16 %v72_v49, %v67_v48 }
   0xe   :  { %1263 = vmatpush1.bf16.msra.mxu0 %v1262_v34  ;;  %1359 = vmatpush1.bf16.msra.mxu1 %v1358_v38  ;;  %v71_v57 = vld [vmem:[%s2657_s1 + $0x178] sm:$0xff]  ;;  %v80_v59 = vld [vmem:[%s2657_s1 + $0x1c0] sm:$0xff]  ;;  %v77_v60 = vld [vmem:[%s2657_s1 + $0x1a8] sm:$0xff]  ;;  %v1270_v62 = vpack.c.bf16 %v69_v54, %v64_v53 }
   0xf   :  { %1265 = vmatprep.subr.bf16.mxu0 %v1264_v39  ;;  %1361 = vmatprep.subr.bf16.mxu1 %v1360_v43  ;;  %v75_v58 = vld [vmem:[%s2657_s1 + $0x198] sm:$0xff]  ;;  %v82_v61 = vld [vmem:[%s2657_s1 + $0x1d0] sm:$0xff]  ;;  %v1366_v63 = vpack.c.bf16 %v71_v57, %v66_v55  ;;  %v76_v3 = vld [vmem:[%s2657_s1 + $0x1a0] sm:$0xff] }
  0x10   :  { %v1272_v0 = vpack.c.bf16 %v80_v59, %v75_v58  ;;  %v74_v1 = vld [vmem:[%s2657_s1 + $0x190] sm:$0xff]  ;;  %v79_v2 = vld [vmem:[%s2657_s1 + $0x1b8] sm:$0xff]  ;;  %v1368_v4 = vpack.c.bf16 %v82_v61, %v77_v60  ;;  %v81_v5 = vld [vmem:[%s2657_s1 + $0x1c8] sm:$0xff] }
  0x11   :  { %v85_v6 = vld [vmem:[%s2657_s1 + $0x1e8] sm:$0xff]  ;;  %v90_v7 = vld [vmem:[%s2657_s1 + $0x210] sm:$0xff]  ;;  %v87_v8 = vld [vmem:[%s2657_s1 + $0x1f8] sm:$0xff]  ;;  %v1274_v10 = vpack.c.bf16 %v79_v2, %v74_v1  ;;  %v1370_v11 = vpack.c.bf16 %v81_v5, %v76_v3 }
  0x12   :  { %1267 = vmatpush1.bf16.msra.mxu0 %v1266_v50  ;;  %1363 = vmatpush1.bf16.msra.mxu1 %v1362_v51  ;;  %v92_v9 = vld [vmem:[%s2657_s1 + $0x220] sm:$0xff]  ;;  %v1276_v12 = vpack.c.bf16 %v90_v7, %v85_v6  ;;  %v89_v14 = vld [vmem:[%s2657_s1 + $0x208] sm:$0xff]  ;;  %v86_v15 = vld [vmem:[%s2657_s1 + $0x1f0] sm:$0xff] }
  0x13   :  { %1269 = vmatprep.subr.bf16.mxu0 %v1268_v52  ;;  %1365 = vmatprep.subr.bf16.mxu1 %v1364_v56  ;;  %v84_v13 = vld [vmem:[%s2657_s1 + $0x1e0] sm:$0xff]  ;;  %v1372_v16 = vpack.c.bf16 %v92_v9, %v87_v8  ;;  %v91_v17 = vld [vmem:[%s2657_s1 + $0x218] sm:$0xff]  ;;  %v97_v20 = vld [vmem:[%s2657_s1 + $0x248] sm:$0xff] }
  0x14   :  { %v95_v18 = vld [vmem:[%s2657_s1 + $0x238] sm:$0xff]  ;;  %v100_v19 = vld [vmem:[%s2657_s1 + $0x260] sm:$0xff]  ;;  %v102_v21 = vld [vmem:[%s2657_s1 + $0x270] sm:$0xff]  ;;  %v1278_v22 = vpack.c.bf16 %v89_v14, %v84_v13  ;;  %v1374_v23 = vpack.c.bf16 %v91_v17, %v86_v15 }
  0x15   :  { %v1280_v24 = vpack.c.bf16 %v100_v19, %v95_v18  ;;  %v94_v25 = vld [vmem:[%s2657_s1 + $0x230] sm:$0xff]  ;;  %v99_v26 = vld [vmem:[%s2657_s1 + $0x258] sm:$0xff]  ;;  %v96_v27 = vld [vmem:[%s2657_s1 + $0x240] sm:$0xff]  ;;  %v1376_v28 = vpack.c.bf16 %v102_v21, %v97_v20 }
  0x16   :  { %1271 = vmatpush1.bf16.msra.mxu0 %v1270_v62  ;;  %1367 = vmatpush1.bf16.msra.mxu1 %v1366_v63  ;;  %v101_v29 = vld [vmem:[%s2657_s1 + $0x268] sm:$0xff]  ;;  %v110_v31 = vld [vmem:[%s2657_s1 + $0x2b0] sm:$0xff]  ;;  %v107_v32 = vld [vmem:[%s2657_s1 + $0x298] sm:$0xff]  ;;  %v1282_v34 = vpack.c.bf16 %v99_v26, %v94_v25 }
  0x17   :  { %1273 = vmatprep.subr.bf16.mxu0 %v1272_v0  ;;  %1369 = vmatprep.subr.bf16.mxu1 %v1368_v4  ;;  %v105_v30 = vld [vmem:[%s2657_s1 + $0x288] sm:$0xff]  ;;  %v112_v33 = vld [vmem:[%s2657_s1 + $0x2c0] sm:$0xff]  ;;  %v1378_v35 = vpack.c.bf16 %v101_v29, %v96_v27  ;;  %v106_v39 = vld [vmem:[%s2657_s1 + $0x290] sm:$0xff] }
  0x18   :  { %v1284_v36 = vpack.c.bf16 %v110_v31, %v105_v30  ;;  %v104_v37 = vld [vmem:[%s2657_s1 + $0x280] sm:$0xff]  ;;  %v109_v38 = vld [vmem:[%s2657_s1 + $0x2a8] sm:$0xff]  ;;  %v1380_v40 = vpack.c.bf16 %v112_v33, %v107_v32  ;;  %v111_v41 = vld [vmem:[%s2657_s1 + $0x2b8] sm:$0xff] }
  0x19   :  { %v115_v42 = vld [vmem:[%s2657_s1 + $0x2d8] sm:$0xff]  ;;  %v120_v43 = vld [vmem:[%s2657_s1 + $0x300] sm:$0xff]  ;;  %v117_v44 = vld [vmem:[%s2657_s1 + $0x2e8] sm:$0xff]  ;;  %v1286_v46 = vpack.c.bf16 %v109_v38, %v104_v37  ;;  %v1382_v47 = vpack.c.bf16 %v111_v41, %v106_v39 }
  0x1a   :  { %1275 = vmatpush1.bf16.msra.mxu0 %v1274_v10  ;;  %1371 = vmatpush1.bf16.msra.mxu1 %v1370_v11  ;;  %v122_v45 = vld [vmem:[%s2657_s1 + $0x310] sm:$0xff]  ;;  %v1288_v48 = vpack.c.bf16 %v120_v43, %v115_v42  ;;  %v119_v50 = vld [vmem:[%s2657_s1 + $0x2f8] sm:$0xff]  ;;  %v116_v51 = vld [vmem:[%s2657_s1 + $0x2e0] sm:$0xff] }
  0x1b   :  { %1277 = vmatprep.subr.bf16.mxu0 %v1276_v12  ;;  %1373 = vmatprep.subr.bf16.mxu1 %v1372_v16  ;;  %v114_v49 = vld [vmem:[%s2657_s1 + $0x2d0] sm:$0xff]  ;;  %v1384_v52 = vpack.c.bf16 %v122_v45, %v117_v44  ;;  %v121_v53 = vld [vmem:[%s2657_s1 + $0x308] sm:$0xff]  ;;  %v127_v56 = vld [vmem:[%s2657_s1 + $0x338] sm:$0xff] }
  0x1c   :  { %v125_v54 = vld [vmem:[%s2657_s1 + $0x328] sm:$0xff]  ;;  %v130_v55 = vld [vmem:[%s2657_s1 + $0x350] sm:$0xff]  ;;  %v132_v57 = vld [vmem:[%s2657_s1 + $0x360] sm:$0xff]  ;;  %v1290_v58 = vpack.c.bf16 %v119_v50, %v114_v49  ;;  %v1386_v59 = vpack.c.bf16 %v121_v53, %v116_v51 }
  0x1d   :  { %v1292_v60 = vpack.c.bf16 %v130_v55, %v125_v54  ;;  %v124_v61 = vld [vmem:[%s2657_s1 + $0x320] sm:$0xff]  ;;  %v129_v62 = vld [vmem:[%s2657_s1 + $0x348] sm:$0xff]  ;;  %v126_v63 = vld [vmem:[%s2657_s1 + $0x330] sm:$0xff]  ;;  %v1388_v0 = vpack.c.bf16 %v132_v57, %v127_v56 }
  0x1e   :  { %1279 = vmatpush1.bf16.msra.mxu0 %v1278_v22  ;;  %1375 = vmatpush1.bf16.msra.mxu1 %v1374_v23  ;;  %v131_v1 = vld [vmem:[%s2657_s1 + $0x358] sm:$0xff]  ;;  %v140_v3 = vld [vmem:[%s2657_s1 + $0x3a0] sm:$0xff]  ;;  %v137_v4 = vld [vmem:[%s2657_s1 + $0x388] sm:$0xff]  ;;  %v1294_v6 = vpack.c.bf16 %v129_v62, %v124_v61 }
  0x1f   :  { %1281 = vmatprep.subr.bf16.mxu0 %v1280_v24  ;;  %1377 = vmatprep.subr.bf16.mxu1 %v1376_v28  ;;  %v135_v2 = vld [vmem:[%s2657_s1 + $0x378] sm:$0xff]  ;;  %v142_v5 = vld [vmem:[%s2657_s1 + $0x3b0] sm:$0xff]  ;;  %v1390_v8 = vpack.c.bf16 %v131_v1, %v126_v63  ;;  %v136_v11 = vld [vmem:[%s2657_s1 + $0x380] sm:$0xff] }
  0x20   :  { %v134_v7 = vld [vmem:[%s2657_s1 + $0x370] sm:$0xff]  ;;  %v1296_v9 = vpack.c.bf16 %v140_v3, %v135_v2  ;;  %v139_v10 = vld [vmem:[%s2657_s1 + $0x398] sm:$0xff]  ;;  %v141_v12 = vld [vmem:[%s2657_s1 + $0x3a8] sm:$0xff]  ;;  %v1392_v13 = vpack.c.bf16 %v142_v5, %v137_v4 }
  0x21   :  { %v145_v14 = vld [vmem:[%s2657_s1 + $0x3c8] sm:$0xff]  ;;  %v150_v15 = vld [vmem:[%s2657_s1 + $0x3f0] sm:$0xff]  ;;  %v147_v17 = vld [vmem:[%s2657_s1 + $0x3d8] sm:$0xff]  ;;  %v1298_v19 = vpack.c.bf16 %v139_v10, %v134_v7  ;;  %v1394_v20 = vpack.c.bf16 %v141_v12, %v136_v11 }
  0x22   :  { %1283 = vmatpush1.bf16.msra.mxu0 %v1282_v34  ;;  %1379 = vmatpush1.bf16.msra.mxu1 %v1378_v35  ;;  %v1925_v16 = vld [vmem:[%s2658_s0 + $0x8] sm:$0xff]  ;;  %v152_v18 = vld [vmem:[%s2657_s1 + $0x400] sm:$0xff]  ;;  %v1300_v21 = vpack.c.bf16 %v150_v15, %v145_v14  ;;  %v146_v24 = vld [vmem:[%s2657_s1 + $0x3d0] sm:$0xff] }
  0x23   :  { %1285 = vmatprep.subr.bf16.mxu0 %v1284_v36  ;;  %1381 = vmatprep.subr.bf16.mxu1 %v1380_v40  ;;  %v144_v22 = vld [vmem:[%s2657_s1 + $0x3c0] sm:$0xff]  ;;  %v149_v23 = vld [vmem:[%s2657_s1 + $0x3e8] sm:$0xff]  ;;  %v1396_v25 = vpack.c.bf16 %v152_v18, %v147_v17  ;;  %v151_v26 = vld [vmem:[%s2657_s1 + $0x3f8] sm:$0xff] }
  0x24   :  { %328 = vmatprep.mubr.f32.mxu0 %v1925_v16  ;;  %470 = vmatprep.mubr.f32.mxu1 %v1925_v16  ;;  %v155_v27 = vld [vmem:[%s2657_s1 + $0x418] sm:$0xff]  ;;  %v160_v28 = vld [vmem:[%s2657_s1 + $0x440] sm:$0xff]  ;;  %v157_v29 = vld [vmem:[%s2657_s1 + $0x428] sm:$0xff]  ;;  %v1302_v31 = vpack.c.bf16 %v149_v23, %v144_v22  ;;  %v1398_v32 = vpack.c.bf16 %v151_v26, %v146_v24 }
  0x25   :  { %v162_v30 = vld [vmem:[%s2657_s1 + $0x450] sm:$0xff]  ;;  %v1304_v33 = vpack.c.bf16 %v160_v28, %v155_v27  ;;  %v159_v35 = vld [vmem:[%s2657_s1 + $0x438] sm:$0xff]  ;;  %v156_v36 = vld [vmem:[%s2657_s1 + $0x420] sm:$0xff] }
  0x26   :  { %1287 = vmatpush1.bf16.msra.mxu0 %v1286_v46  ;;  %1383 = vmatpush1.bf16.msra.mxu1 %v1382_v47  ;;  %v154_v34 = vld [vmem:[%s2657_s1 + $0x410] sm:$0xff]  ;;  %v1400_v37 = vpack.c.bf16 %v162_v30, %v157_v29  ;;  %v161_v38 = vld [vmem:[%s2657_s1 + $0x448] sm:$0xff]  ;;  %v167_v41 = vld [vmem:[%s2657_s1 + $0x478] sm:$0xff] }
  0x27   :  { %1289 = vmatprep.subr.bf16.mxu0 %v1288_v48  ;;  %1385 = vmatprep.subr.bf16.mxu1 %v1384_v52  ;;  %v165_v39 = vld [vmem:[%s2657_s1 + $0x468] sm:$0xff]  ;;  %v170_v40 = vld [vmem:[%s2657_s1 + $0x490] sm:$0xff]  ;;  %v172_v42 = vld [vmem:[%s2657_s1 + $0x4a0] sm:$0xff]  ;;  %v1306_v43 = vpack.c.bf16 %v159_v35, %v154_v34  ;;  %v1402_v44 = vpack.c.bf16 %v161_v38, %v156_v36 }
  0x28   :  { %v1308_v45 = vpack.c.bf16 %v170_v40, %v165_v39  ;;  %v164_v46 = vld [vmem:[%s2657_s1 + $0x460] sm:$0xff]  ;;  %v169_v47 = vld [vmem:[%s2657_s1 + $0x488] sm:$0xff]  ;;  %v166_v48 = vld [vmem:[%s2657_s1 + $0x470] sm:$0xff]  ;;  %v1404_v49 = vpack.c.bf16 %v172_v42, %v167_v41  ;;  %v1595_v39 = vmov 0.0  }
  0x29   :  { %v171_v50 = vld [vmem:[%s2657_s1 + $0x498] sm:$0xff]  ;;  %v180_v52 = vld [vmem:[%s2657_s1 + $0x4e0] sm:$0xff]  ;;  %v177_v53 = vld [vmem:[%s2657_s1 + $0x4c8] sm:$0xff]  ;;  %v1310_v55 = vpack.c.bf16 %v169_v47, %v164_v46 }
  0x2a   :  { %1291 = vmatpush1.bf16.msra.mxu0 %v1290_v58  ;;  %1387 = vmatpush1.bf16.msra.mxu1 %v1386_v59  ;;  %v175_v51 = vld [vmem:[%s2657_s1 + $0x4b8] sm:$0xff]  ;;  %v182_v54 = vld [vmem:[%s2657_s1 + $0x4f0] sm:$0xff]  ;;  %v1406_v56 = vpack.c.bf16 %v171_v50, %v166_v48  ;;  %v181_v62 = vld [vmem:[%s2657_s1 + $0x4e8] sm:$0xff] }
  0x2b   :  { %1293 = vmatprep.subr.bf16.mxu0 %v1292_v60  ;;  %1389 = vmatprep.subr.bf16.mxu1 %v1388_v0  ;;  %v1312_v57 = vpack.c.bf16 %v180_v52, %v175_v51  ;;  %v174_v58 = vld [vmem:[%s2657_s1 + $0x4b0] sm:$0xff]  ;;  %v179_v59 = vld [vmem:[%s2657_s1 + $0x4d8] sm:$0xff]  ;;  %v176_v60 = vld [vmem:[%s2657_s1 + $0x4c0] sm:$0xff]  ;;  %v1408_v61 = vpack.c.bf16 %v182_v54, %v177_v53 }
  0x2c   :  { %v185_v63 = vld [vmem:[%s2657_s1 + $0x508] sm:$0xff]  ;;  %v190_v0 = vld [vmem:[%s2657_s1 + $0x530] sm:$0xff]  ;;  %v187_v1 = vld [vmem:[%s2657_s1 + $0x518] sm:$0xff]  ;;  %v1314_v3 = vpack.c.bf16 %v179_v59, %v174_v58  ;;  %v1410_v4 = vpack.c.bf16 %v181_v62, %v176_v60 }
  0x2d   :  { %v192_v2 = vld [vmem:[%s2657_s1 + $0x540] sm:$0xff]  ;;  %v1316_v5 = vpack.c.bf16 %v190_v0, %v185_v63  ;;  %v189_v7 = vld [vmem:[%s2657_s1 + $0x528] sm:$0xff]  ;;  %v191_v10 = vld [vmem:[%s2657_s1 + $0x538] sm:$0xff] }
  0x2e   :  { %1295 = vmatpush1.bf16.msra.mxu0 %v1294_v6  ;;  %1391 = vmatpush1.bf16.msra.mxu1 %v1390_v8  ;;  %v184_v6 = vld [vmem:[%s2657_s1 + $0x500] sm:$0xff]  ;;  %v186_v8 = vld [vmem:[%s2657_s1 + $0x510] sm:$0xff]  ;;  %v195_v11 = vld [vmem:[%s2657_s1 + $0x558] sm:$0xff] }
  0x2f   :  { %1297 = vmatprep.subr.bf16.mxu0 %v1296_v9  ;;  %1393 = vmatprep.subr.bf16.mxu1 %v1392_v13  ;;  %v1412_v9 = vpack.c.bf16 %v192_v2, %v187_v1  ;;  %v200_v12 = vld [vmem:[%s2657_s1 + $0x580] sm:$0xff]  ;;  %v197_v13 = vld [vmem:[%s2657_s1 + $0x568] sm:$0xff]  ;;  %v202_v14 = vld [vmem:[%s2657_s1 + $0x590] sm:$0xff]  ;;  %v1318_v17 = vpack.c.bf16 %v189_v7, %v184_v6  ;;  %v1414_v18 = vpack.c.bf16 %v191_v10, %v186_v8 }
  0x30   :  { %v2058_v15 = vld [vmem:[%s2658_s0] sm:$0xff]  ;;  %v1416_v23 = vpack.c.bf16 %v202_v14, %v197_v13  ;;  %v201_v24 = vld [vmem:[%s2657_s1 + $0x588] sm:$0xff]  ;;  %v210_v26 = vld [vmem:[%s2657_s1 + $0x5d0] sm:$0xff] }
  0x31   :  { %v196_v22 = vld [vmem:[%s2657_s1 + $0x560] sm:$0xff]  ;;  %v207_v27 = vld [vmem:[%s2657_s1 + $0x5b8] sm:$0xff]  ;;  %v206_v34 = vld [vmem:[%s2657_s1 + $0x5b0] sm:$0xff] }
  0x32   :  { %1299 = vmatpush1.bf16.msra.mxu0 %v1298_v19  ;;  %1395 = vmatpush1.bf16.msra.mxu1 %v1394_v20  ;;  %v1320_v19 = vpack.c.bf16 %v200_v12, %v195_v11  ;;  %v194_v20 = vld [vmem:[%s2657_s1 + $0x550] sm:$0xff]  ;;  %v212_v28 = vld [vmem:[%s2657_s1 + $0x5e0] sm:$0xff]  ;;  %v1418_v30 = vpack.c.bf16 %v201_v24, %v196_v22  ;;  %v211_v36 = vld [vmem:[%s2657_s1 + $0x5d8] sm:$0xff] }
  0x33   :  { %1301 = vmatprep.subr.bf16.mxu0 %v1300_v21  ;;  %1397 = vmatprep.subr.bf16.mxu1 %v1396_v25  ;;  %v199_v21 = vld [vmem:[%s2657_s1 + $0x578] sm:$0xff]  ;;  %v205_v25 = vld [vmem:[%s2657_s1 + $0x5a8] sm:$0xff]  ;;  %v1420_v35 = vpack.c.bf16 %v212_v28, %v207_v27  ;;  %v220_v38 = vld [vmem:[%s2657_s1 + $0x620] sm:$0xff] }
  0x34   :  { %v1322_v29 = vpack.c.bf16 %v199_v21, %v194_v20  ;;  %v217_v40 = vld [vmem:[%s2657_s1 + $0x608] sm:$0xff]  ;;  %v222_v41 = vld [vmem:[%s2657_s1 + $0x630] sm:$0xff]  ;;  %v219_v46 = vld [vmem:[%s2657_s1 + $0x618] sm:$0xff] }
  0x35   :  { %v216_v47 = vld [vmem:[%s2657_s1 + $0x600] sm:$0xff]  ;;  %v1424_v48 = vpack.c.bf16 %v222_v41, %v217_v40  ;;  %v225_v50 = vld [vmem:[%s2657_s1 + $0x648] sm:$0xff]  ;;  %v230_v51 = vld [vmem:[%s2657_s1 + $0x670] sm:$0xff] }
  0x36   :  { %1303 = vmatpush1.bf16.msra.mxu0 %v1302_v31  ;;  %1399 = vmatpush1.bf16.msra.mxu1 %v1398_v32  ;;  %v1324_v31 = vpack.c.bf16 %v210_v26, %v205_v25  ;;  %v204_v32 = vld [vmem:[%s2657_s1 + $0x5a0] sm:$0xff]  ;;  %v227_v52 = vld [vmem:[%s2657_s1 + $0x658] sm:$0xff]  ;;  %v229_v58 = vld [vmem:[%s2657_s1 + $0x668] sm:$0xff] }
  0x37   :  { %1305 = vmatprep.subr.bf16.mxu0 %v1304_v33  ;;  %1401 = vmatprep.subr.bf16.mxu1 %v1400_v37  ;;  %v209_v33 = vld [vmem:[%s2657_s1 + $0x5c8] sm:$0xff]  ;;  %v215_v37 = vld [vmem:[%s2657_s1 + $0x5f8] sm:$0xff]  ;;  %v232_v53 = vld [vmem:[%s2657_s1 + $0x680] sm:$0xff] }
  0x38   :  { %v1326_v42 = vpack.c.bf16 %v209_v33, %v204_v32  ;;  %v226_v59 = vld [vmem:[%s2657_s1 + $0x650] sm:$0xff]  ;;  %v1428_v60 = vpack.c.bf16 %v232_v53, %v227_v52  ;;  %v235_v62 = vld [vmem:[%s2657_s1 + $0x698] sm:$0xff]  ;;  %v240_v63 = vld [vmem:[%s2657_s1 + $0x6c0] sm:$0xff] }
  0x39   :  { %v237_v0 = vld [vmem:[%s2657_s1 + $0x6a8] sm:$0xff]  ;;  %v242_v1 = vld [vmem:[%s2657_s1 + $0x6d0] sm:$0xff]  ;;  %v239_v6 = vld [vmem:[%s2657_s1 + $0x6b8] sm:$0xff] }
  0x3a   :  { %1307 = vmatpush1.bf16.msra.mxu0 %v1306_v43  ;;  %1403 = vmatpush1.bf16.msra.mxu1 %v1402_v44  ;;  %v1422_v43 = vpack.c.bf16 %v211_v36, %v206_v34  ;;  %v1328_v44 = vpack.c.bf16 %v220_v38, %v215_v37  ;;  %v236_v7 = vld [vmem:[%s2657_s1 + $0x6a0] sm:$0xff]  ;;  %v1432_v8 = vpack.c.bf16 %v242_v1, %v237_v0  ;;  %v245_v10 = vld [vmem:[%s2657_s1 + $0x6e8] sm:$0xff]  ;;  %v250_v11 = vld [vmem:[%s2657_s1 + $0x710] sm:$0xff] }
  0x3b   :  { %1309 = vmatprep.subr.bf16.mxu0 %v1308_v45  ;;  %1405 = vmatprep.subr.bf16.mxu1 %v1404_v49  ;;  %v214_v45 = vld [vmem:[%s2657_s1 + $0x5f0] sm:$0xff]  ;;  %v221_v49 = vld [vmem:[%s2657_s1 + $0x628] sm:$0xff]  ;;  %v247_v12 = vld [vmem:[%s2657_s1 + $0x6f8] sm:$0xff] }
  0x3c   :  { %v1330_v54 = vpack.c.bf16 %v219_v46, %v214_v45  ;;  %v252_v13 = vld [vmem:[%s2657_s1 + $0x720] sm:$0xff]  ;;  %v249_v20 = vld [vmem:[%s2657_s1 + $0x708] sm:$0xff]  ;;  %v246_v21 = vld [vmem:[%s2657_s1 + $0x6f0] sm:$0xff] }
  0x3d   :  { %v1436_v22 = vpack.c.bf16 %v252_v13, %v247_v12  ;;  %v255_v24 = vld [vmem:[%s2657_s1 + $0x738] sm:$0xff]  ;;  %v260_v25 = vld [vmem:[%s2657_s1 + $0x760] sm:$0xff]  ;;  %v257_v26 = vld [vmem:[%s2657_s1 + $0x748] sm:$0xff] }
  0x3e   :  { %1311 = vmatpush1.bf16.msra.mxu0 %v1310_v55  ;;  %1407 = vmatpush1.bf16.msra.mxu1 %v1406_v56  ;;  %v1426_v55 = vpack.c.bf16 %v221_v49, %v216_v47  ;;  %v1332_v56 = vpack.c.bf16 %v230_v51, %v225_v50  ;;  %v262_v27 = vld [vmem:[%s2657_s1 + $0x770] sm:$0xff]  ;;  %v259_v32 = vld [vmem:[%s2657_s1 + $0x758] sm:$0xff]  ;;  %v256_v33 = vld [vmem:[%s2657_s1 + $0x740] sm:$0xff] }
  0x3f   :  { %1313 = vmatprep.subr.bf16.mxu0 %v1312_v57  ;;  %1409 = vmatprep.subr.bf16.mxu1 %v1408_v61  ;;  %v224_v57 = vld [vmem:[%s2657_s1 + $0x640] sm:$0xff]  ;;  %v231_v61 = vld [vmem:[%s2657_s1 + $0x678] sm:$0xff]  ;;  %v1440_v34 = vpack.c.bf16 %v262_v27, %v257_v26  ;;  %v113_v37 = vld [vmem:[%s2657_s1 + $0x2c8] sm:$0xff] }
  0x40   :  { %v1334_v2 = vpack.c.bf16 %v229_v58, %v224_v57  ;;  %v108_v36 = vld [vmem:[%s2657_s1 + $0x2a0] sm:$0xff]  ;;  %v193_v45 = vld [vmem:[%s2657_s1 + $0x548] sm:$0xff]  ;;  %v118_v46 = vld [vmem:[%s2657_s1 + $0x2f0] sm:$0xff] }
  0x41   :  { %v1444_v41 = vpack.c.bf16 %v113_v37, %v108_v36  ;;  %v123_v47 = vld [vmem:[%s2657_s1 + $0x318] sm:$0xff]  ;;  %v38_v52 = vld [vmem:[%s2657_s1 + $0x70] sm:$0xff]  ;;  %v128_v57 = vld [vmem:[%s2657_s1 + $0x340] sm:$0xff] }
  0x42   :  { %1315 = vmatpush1.bf16.msra.mxu0 %v1314_v3  ;;  %1411 = vmatpush1.bf16.msra.mxu1 %v1410_v4  ;;  %v1430_v3 = vpack.c.bf16 %v231_v61, %v226_v59  ;;  %v1336_v4 = vpack.c.bf16 %v240_v63, %v235_v62  ;;  %v1448_v51 = vpack.c.bf16 %v123_v47, %v118_v46  ;;  %v43_v53 = vld [vmem:[%s2657_s1 + $0x98] sm:$0xff]  ;;  %v133_v58 = vld [vmem:[%s2657_s1 + $0x368] sm:$0xff]  ;;  %v48_v62 = vld [vmem:[%s2657_s1 + $0xc0] sm:$0xff] }
  0x43   :  { %1317 = vmatprep.subr.bf16.mxu0 %v1316_v5  ;;  %1413 = vmatprep.subr.bf16.mxu1 %v1412_v9  ;;  %v234_v5 = vld [vmem:[%s2657_s1 + $0x690] sm:$0xff]  ;;  %v241_v9 = vld [vmem:[%s2657_s1 + $0x6c8] sm:$0xff]  ;;  %v1450_v59 = vpack.c.bf16 %v43_v53, %v38_v52  ;;  %v1452_v61 = vpack.c.bf16 %v133_v58, %v128_v57  ;;  %v208_v0 = vld [vmem:[%s2657_s1 + $0x5c0] sm:$0xff] }
  0x44   :  { %v1338_v14 = vpack.c.bf16 %v239_v6, %v234_v5  ;;  %v53_v63 = vld [vmem:[%s2657_s1 + $0xe8] sm:$0xff]  ;;  %v78_v26 = vld [vmem:[%s2657_s1 + $0x1b0] sm:$0xff]  ;;  %v83_v27 = vld [vmem:[%s2657_s1 + $0x1d8] sm:$0xff] }
  0x45   :  { %329 = vmatmul.mubr.f32.vlgmr.msra.gmra.mrb[0].mxu0 %v2058_v15  ;;  %471 = vmatmul.mubr.f32.vlgmr.msra.gmra.mrb[0].mxu1 %v2058_v15  ;;  %v213_v1 = vld [vmem:[%s2657_s1 + $0x5e8] sm:$0xff]  ;;  %v248_v37 = vld [vmem:[%s2657_s1 + $0x700] sm:$0xff]  ;;  %v103_v46 = vld [vmem:[%s2657_s1 + $0x278] sm:$0xff] }
  0x46   :  { %1319 = vmatpush1.bf16.msra.mxu0 %v1318_v17  ;;  %1415 = vmatpush1.bf16.msra.mxu1 %v1414_v18  ;;  %v1434_v17 = vpack.c.bf16 %v241_v9, %v236_v7  ;;  %v1340_v18 = vpack.c.bf16 %v250_v11, %v245_v10  ;;  %v1483_v5 = vpack.c.bf16 %v213_v1, %v208_v0  ;;  %v58_v7 = vld [vmem:[%s2657_s1 + $0x110] sm:$0xff]  ;;  %v223_v9 = vld [vmem:[%s2657_s1 + $0x638] sm:$0xff]  ;;  %v148_v10 = vld [vmem:[%s2657_s1 + $0x3e0] sm:$0xff] }
  0x47   :  { %1321 = vmatprep.subr.bf16.mxu0 %v1320_v19  ;;  %1417 = vmatprep.subr.bf16.mxu1 %v1416_v23  ;;  %v244_v19 = vld [vmem:[%s2657_s1 + $0x6e0] sm:$0xff]  ;;  %v251_v23 = vld [vmem:[%s2657_s1 + $0x718] sm:$0xff]  ;;  %v153_v11 = vld [vmem:[%s2657_s1 + $0x408] sm:$0xff] }
  0x48   :  { %399 = vmatprep.mubr.f32.mxu0 %v1595_v39  ;;  %541 = vmatprep.mubr.f32.mxu1 %v1595_v39  ;;  %v1342_v28 = vpack.c.bf16 %v249_v20, %v244_v19  ;;  %v228_v19 = vld [vmem:[%s2657_s1 + $0x660] sm:$0xff]  ;;  %v233_v20 = vld [vmem:[%s2657_s1 + $0x688] sm:$0xff]  ;;  %v258_v47 = vld [vmem:[%s2657_s1 + $0x750] sm:$0xff] }
  0x49   :  { %v93_v36 = vld [vmem:[%s2657_s1 + $0x228] sm:$0xff]  ;;  %v793_v52 = vld [vmem:[%s2659_s3 + $0x180] sm:$0xff]  ;;  %v764_v0 = vld [vmem:[%s2659_s3 + $0x98] sm:$0xff] }
  0x4a   :  { %1323 = vmatpush1.bf16.msra.mxu0 %v1322_v29  ;;  %1419 = vmatpush1.bf16.msra.mxu1 %v1418_v30  ;;  %v1438_v29 = vpack.c.bf16 %v251_v23, %v246_v21  ;;  %v1344_v30 = vpack.c.bf16 %v260_v25, %v255_v24  ;;  %v158_v21 = vld [vmem:[%s2657_s1 + $0x430] sm:$0xff]  ;;  %v1489_v24 = vpack.c.bf16 %v233_v20, %v228_v19  ;;  %v794_v53 = vld [vmem:[%s2659_s3 + $0x188] sm:$0xff]  ;;  %v745_v58 = vld [vmem:[%s2659_s3] sm:$0xff] }
  0x4b   :  { %1325 = vmatprep.subr.bf16.mxu0 %v1324_v31  ;;  %1421 = vmatprep.subr.bf16.mxu1 %v1420_v35  ;;  %v254_v31 = vld [vmem:[%s2657_s1 + $0x730] sm:$0xff]  ;;  %v261_v35 = vld [vmem:[%s2657_s1 + $0x768] sm:$0xff]  ;;  %v781_v20 = vld [vmem:[%s2659_s3 + $0x120] sm:$0xff] }
  0x4c   :  { %v1346_v38 = vpack.c.bf16 %v259_v32, %v254_v31  ;;  %v1442_v40 = vpack.c.bf16 %v261_v35, %v256_v33  ;;  %v173_v31 = vld [vmem:[%s2657_s1 + $0x4a8] sm:$0xff]  ;;  %v1466_v32 = vpack.c.bf16 %v83_v27, %v78_v26  ;;  %v88_v35 = vld [vmem:[%s2657_s1 + $0x200] sm:$0xff]  ;;  %v795_v1 = vld [vmem:[%s2659_s3 + $0x190] sm:$0xff] }
  0x4d   :  { %v750_v19 = vld [vmem:[%s2659_s3 + $0x28] sm:$0xff] }
  0x4e   :  { %1327 = vmatpush1.bf16.msra.mxu0 %v1326_v42  ;;  %1423 = vmatpush1.bf16.msra.mxu1 %v1422_v43  ;;  %v28_v42 = vld [vmem:[%s2657_s1 + $0x20] sm:$0xff]  ;;  %v33_v43 = vld [vmem:[%s2657_s1 + $0x48] sm:$0xff] }
  0x4f   :  { %1329 = vmatprep.subr.bf16.mxu0 %v1328_v44  ;;  %1425 = vmatprep.subr.bf16.mxu1 %v1424_v48  ;;  %v188_v44 = vld [vmem:[%s2657_s1 + $0x520] sm:$0xff]  ;;  %v2247_v48 = vld [vmem:[%s2658_s0 + $0x10] sm:$0xff]  ;;  %v1446_v49 = vpack.c.bf16 %v33_v43, %v28_v42  ;;  %v1470_v42 = vpack.c.bf16 %v93_v36, %v88_v35  ;;  %v770_v35 = vld [vmem:[%s2659_s3 + $0xc8] sm:$0xff] }
  0x50   :  { %v1477_v50 = vpack.c.bf16 %v193_v45, %v188_v44  ;;  %v98_v45 = vld [vmem:[%s2657_s1 + $0x250] sm:$0xff]  ;;  %v801_v36 = vld [vmem:[%s2659_s3 + $0x1c0] sm:$0xff] }
  0x52   :  { %1331 = vmatpush1.bf16.msra.mxu0 %v1330_v54  ;;  %1427 = vmatpush1.bf16.msra.mxu1 %v1426_v55  ;;  %v198_v54 = vld [vmem:[%s2657_s1 + $0x570] sm:$0xff]  ;;  %v1596_v55 = vmov 0.0|0.0  }
  0x53   :  { %1333 = vmatprep.subr.bf16.mxu0 %v1332_v56  ;;  %1429 = vmatprep.subr.bf16.mxu1 %v1428_v60  ;;  %v203_v56 = vld [vmem:[%s2657_s1 + $0x598] sm:$0xff] }
  0x54   :  { %v1480_v60 = vpack.c.bf16 %v203_v56, %v198_v54  ;;  %v1474_v54 = vpack.c.bf16 %v103_v46, %v98_v45  ;;  %v786_v46 = vld [vmem:[%s2659_s3 + $0x148] sm:$0xff] }
  0x56   :  { %1335 = vmatpush1.bf16.msra.mxu0 %v1334_v2  ;;  %1431 = vmatpush1.bf16.msra.mxu1 %v1430_v3  ;;  %v138_v2 = vld [vmem:[%s2657_s1 + $0x390] sm:$0xff]  ;;  %v143_v3 = vld [vmem:[%s2657_s1 + $0x3b8] sm:$0xff] }
  0x57   :  { %1337 = vmatprep.subr.bf16.mxu0 %v1336_v4  ;;  %1433 = vmatprep.subr.bf16.mxu1 %v1432_v8  ;;  %v1454_v4 = vpack.c.bf16 %v53_v63, %v48_v62  ;;  %v1456_v6 = vpack.c.bf16 %v143_v3, %v138_v2  ;;  %v63_v8 = vld [vmem:[%s2657_s1 + $0x138] sm:$0xff]  ;;  %v778_v62 = vld [vmem:[%s2659_s3 + $0x108] sm:$0xff]  ;;  %v763_v63 = vld [vmem:[%s2659_s3 + $0x90] sm:$0xff] }
  0x58   :  { %v1458_v12 = vpack.c.bf16 %v63_v8, %v58_v7  ;;  %v796_v2 = vld [vmem:[%s2659_s3 + $0x198] sm:$0xff]  ;;  %v779_v8 = vld [vmem:[%s2659_s3 + $0x110] sm:$0xff] }
  0x59   :  { %v748_v7 = vld [vmem:[%s2659_s3 + $0x18] sm:$0xff] }
  0x5a   :  { %1339 = vmatpush1.bf16.msra.mxu0 %v1338_v14  ;;  %1435 = vmatpush1.bf16.msra.mxu1 %v1434_v17  ;;  %v1460_v14 = vpack.c.bf16 %v153_v11, %v148_v10  ;;  %v68_v17 = vld [vmem:[%s2657_s1 + $0x160] sm:$0xff]  ;;  %v766_v11 = vld [vmem:[%s2659_s3 + $0xa8] sm:$0xff] }
  0x5b   :  { %1341 = vmatprep.subr.bf16.mxu0 %v1340_v18  ;;  %1437 = vmatprep.subr.bf16.mxu1 %v1436_v22  ;;  %v73_v18 = vld [vmem:[%s2657_s1 + $0x188] sm:$0xff]  ;;  %v163_v22 = vld [vmem:[%s2657_s1 + $0x458] sm:$0xff]  ;;  %v765_v10 = vld [vmem:[%s2659_s3 + $0xa0] sm:$0xff] }
  0x5c   :  { %v1462_v23 = vpack.c.bf16 %v73_v18, %v68_v17  ;;  %v1464_v25 = vpack.c.bf16 %v163_v22, %v158_v21  ;;  %v1508_v18 = vpack.c.bf16 %v766_v11, %v765_v10  ;;  %v782_v21 = vld [vmem:[%s2659_s3 + $0x128] sm:$0xff]  ;;  %v767_v22 = vld [vmem:[%s2659_s3 + $0xb0] sm:$0xff]  ;;  %v776_v11 = vld [vmem:[%s2659_s3 + $0xf8] sm:$0xff] }
  0x5d   :  { %v1542_v27 = vpack.c.bf16 %v782_v21, %v781_v20  ;;  %v775_v10 = vld [vmem:[%s2659_s3 + $0xf0] sm:$0xff] }
  0x5e   :  { %1343 = vmatpush1.bf16.msra.mxu0 %v1342_v28  ;;  %1439 = vmatpush1.bf16.msra.mxu1 %v1438_v29  ;;  %v238_v28 = vld [vmem:[%s2657_s1 + $0x6b0] sm:$0xff]  ;;  %v243_v29 = vld [vmem:[%s2657_s1 + $0x6d8] sm:$0xff] }
  0x5f   :  { %1345 = vmatprep.subr.bf16.mxu0 %v1344_v30  ;;  %1441 = vmatprep.subr.bf16.mxu1 %v1440_v34  ;;  %v168_v30 = vld [vmem:[%s2657_s1 + $0x480] sm:$0xff]  ;;  %v1492_v33 = vpack.c.bf16 %v243_v29, %v238_v28  ;;  %v751_v29 = vld [vmem:[%s2659_s3 + $0x30] sm:$0xff] }
  0x60   :  { %v1468_v34 = vpack.c.bf16 %v173_v31, %v168_v30  ;;  %v752_v30 = vld [vmem:[%s2659_s3 + $0x38] sm:$0xff]  ;;  %v783_v31 = vld [vmem:[%s2659_s3 + $0x130] sm:$0xff] }
  0x61   :  { %v791_v20 = vld [vmem:[%s2659_s3 + $0x170] sm:$0xff] }
  0x62   :  { %1347 = vmatpush1.bf16.msra.mxu0 %v1346_v38  ;;  %1443 = vmatpush1.bf16.msra.mxu1 %v1442_v40  ;;  %v253_v38 = vld [vmem:[%s2657_s1 + $0x728] sm:$0xff]  ;;  %v178_v40 = vld [vmem:[%s2657_s1 + $0x4d0] sm:$0xff] }
  0x63   :  { %1445 = vmatprep.subr.bf16.mxu0 %v1444_v41  ;;  %1476 = vmatprep.subr.bf16.mxu1 %v1596_v55  ;;  %v183_v41 = vld [vmem:[%s2657_s1 + $0x4f8] sm:$0xff]  ;;  %v1495_v43 = vpack.c.bf16 %v253_v38, %v248_v37  ;;  %v802_v37 = vld [vmem:[%s2659_s3 + $0x1c8] sm:$0xff]  ;;  %v1514_v38 = vpack.c.bf16 %v752_v30, %v751_v29 }
  0x64   :  { %v1472_v44 = vpack.c.bf16 %v183_v41, %v178_v40  ;;  %v1548_v45 = vpack.c.bf16 %v802_v37, %v801_v36  ;;  %v809_v37 = vld [vmem:[%s2659_s3 + $0x200] sm:$0xff] }
  0x65   :  { %400 = vmatmul.mubr.f32.vlgmr.msra.gmra.mrb[0].mxu0 %v2247_v48  ;;  %542 = vmatmul.mubr.f32.vlgmr.msra.gmra.mrb[0].mxu1 %v2247_v48 }
  0x66   :  { %1447 = vmatpush3.bf16.msra.mxu0 %v1446_v49  ;;  %1478 = vmatpush3.bf16.msra.mxu1 %v1477_v50  ;;  %v263_v49 = vld [vmem:[%s2657_s1 + $0x778] sm:$0xff]  ;;  %v761_v50 = vld [vmem:[%s2659_s3 + $0x80] sm:$0xff] }
  0x67   :  { %1449 = vmatprep.subr.bf16.mxu0 %v1448_v51  ;;  %1479 = vmatprep.subr.bf16.mxu1 %v1596_v55  ;;  %v762_v51 = vld [vmem:[%s2659_s3 + $0x88] sm:$0xff]  ;;  %v1498_v56 = vpack.c.bf16 %v263_v49, %v258_v47  ;;  %v771_v47 = vld [vmem:[%s2659_s3 + $0xd0] sm:$0xff]  ;;  %v772_v49 = vld [vmem:[%s2659_s3 + $0xd8] sm:$0xff] }
  0x68   :  { %612 = vmatprep.mubr.f32.mxu0 %v1925_v16  ;;  %1214 = vmatprep.mubr.msk.f32.mxu1 %vm1597_vm0, %v1595_v39  ;;  %v218_v16 = vld [vmem:[%s2657_s1 + $0x610] sm:$0xff]  ;;  %v1500_v57 = vpack.c.bf16 %v762_v51, %v761_v50  ;;  %v804_v51 = vld [vmem:[%s2659_s3 + $0x1d8] sm:$0xff] }
  0x69   :  { %v1486_v13 = vpack.c.bf16 %v223_v9, %v218_v16  ;;  %v1536_v16 = vpack.c.bf16 %v796_v2, %v795_v1  ;;  %v780_v9 = vld [vmem:[%s2659_s3 + $0x118] sm:$0xff]  ;;  %v803_v50 = vld [vmem:[%s2659_s3 + $0x1d0] sm:$0xff] }
  0x6a   :  { %1451 = vmatpush3.bf16.msra.mxu0 %v1450_v59  ;;  %1481 = vmatpush3.bf16.msra.mxu1 %v1480_v60  ;;  %v746_v59 = vld [vmem:[%s2659_s3 + $0x8] sm:$0xff]  ;;  %v777_v60 = vld [vmem:[%s2659_s3 + $0x100] sm:$0xff]  ;;  %v1538_v17 = vpack.c.bf16 %v780_v9, %v779_v8 }
  0x6b   :  { %1453 = vmatprep.subr.bf16.mxu0 %v1452_v61  ;;  %1482 = vmatprep.subr.bf16.mxu1 %v1596_v55  ;;  %v1532_v61 = vpack.c.bf16 %v794_v53, %v793_v52  ;;  %v1502_v3 = vpack.c.bf16 %v746_v59, %v745_v58  ;;  %v787_v58 = vld [vmem:[%s2659_s3 + $0x150] sm:$0xff]  ;;  %v1552_v59 = vpack.c.bf16 %v804_v51, %v803_v50  ;;  %v812_v50 = vld [vmem:[%s2659_s3 + $0x218] sm:$0xff] }
  0x6e   :  { %1455 = vmatpush3.bf16.msra.mxu0 %v1454_v4  ;;  %1484 = vmatpush3.bf16.msra.mxu1 %v1483_v5  ;;  %v1534_v4 = vpack.c.bf16 %v778_v62, %v777_v60  ;;  %v1504_v5 = vpack.c.bf16 %v764_v0, %v763_v63  ;;  %v788_v60 = vld [vmem:[%s2659_s3 + $0x158] sm:$0xff]  ;;  %v774_v62 = vld [vmem:[%s2659_s3 + $0xe8] sm:$0xff]  ;;  %v805_v63 = vld [vmem:[%s2659_s3 + $0x1e0] sm:$0xff] }
  0x6f   :  { %1457 = vmatprep.subr.bf16.mxu0 %v1456_v6  ;;  %1485 = vmatprep.subr.bf16.mxu1 %v1596_v55  ;;  %v747_v6 = vld [vmem:[%s2659_s3 + $0x10] sm:$0xff]  ;;  %v806_v0 = vld [vmem:[%s2659_s3 + $0x1e8] sm:$0xff]  ;;  %v1554_v2 = vpack.c.bf16 %v788_v60, %v787_v58  ;;  %v816_v58 = vld [vmem:[%s2659_s3 + $0x238] sm:$0xff] }
  0x70   :  { %v818_v60 = vld [vmem:[%s2659_s3 + $0x248] sm:$0xff] }
  0x72   :  { %1459 = vmatpush3.bf16.msra.mxu0 %v1458_v12  ;;  %1487 = vmatpush3.bf16.msra.mxu1 %v1486_v13  ;;  %v797_v12 = vld [vmem:[%s2659_s3 + $0x1a0] sm:$0xff]  ;;  %v798_v13 = vld [vmem:[%s2659_s3 + $0x1a8] sm:$0xff] }
  0x73   :  { %1461 = vmatprep.subr.bf16.mxu0 %v1460_v14  ;;  %1488 = vmatprep.subr.bf16.mxu1 %v1596_v55  ;;  %v1506_v14 = vpack.c.bf16 %v748_v7, %v747_v6  ;;  %v758_v6 = vld [vmem:[%s2659_s3 + $0x68] sm:$0xff]  ;;  %v789_v7 = vld [vmem:[%s2659_s3 + $0x160] sm:$0xff] }
  0x76   :  { %1463 = vmatpush3.bf16.msra.mxu0 %v1462_v23  ;;  %1490 = vmatpush3.bf16.msra.mxu1 %v1489_v24  ;;  %v768_v23 = vld [vmem:[%s2659_s3 + $0xb8] sm:$0xff]  ;;  %v799_v24 = vld [vmem:[%s2659_s3 + $0x1b0] sm:$0xff] }
  0x77   :  { %1465 = vmatprep.subr.bf16.mxu0 %v1464_v25  ;;  %1491 = vmatprep.subr.bf16.mxu1 %v1596_v55  ;;  %v800_v25 = vld [vmem:[%s2659_s3 + $0x1b8] sm:$0xff]  ;;  %v1512_v28 = vpack.c.bf16 %v768_v23, %v767_v22  ;;  %v700_v22 = vlaneseq }
  0x79   :  { %v2577_v23 = vshrl.u32 %v700_v22, 7 }
  0x7a   :  { %1467 = vmatpush3.bf16.msra.mxu0 %v1466_v32  ;;  %1493 = vmatpush3.bf16.msra.mxu1 %v1492_v33  ;;  %v1544_v32 = vpack.c.bf16 %v800_v25, %v799_v24  ;;  %v784_v33 = vld [vmem:[%s2659_s3 + $0x138] sm:$0xff]  ;;  %v2583_v25 = vld [vmem:[%s2660_s2] sm:$0x1f] }
  0x7b   :  { %1469 = vmatprep.subr.bf16.mxu0 %v1468_v34  ;;  %1494 = vmatprep.subr.bf16.mxu1 %v1596_v55  ;;  %v769_v34 = vld [vmem:[%s2659_s3 + $0xc0] sm:$0xff]  ;;  %v1546_v40 = vpack.c.bf16 %v784_v33, %v783_v31  ;;  %v702_v24 = vsub.s32 0, %v2577_v23 }
  0x7c   :  { %v1516_v41 = vpack.c.bf16 %v770_v35, %v769_v34 }
  0x7d   :  { %v703_v29 = vrot.slane %v2583_v25, %v702_v24 }
  0x7e   :  { %1471 = vmatpush3.bf16.msra.mxu0 %v1470_v42  ;;  %1496 = vmatpush3.bf16.msra.mxu1 %v1495_v43  ;;  %v753_v42 = vld [vmem:[%s2659_s3 + $0x40] sm:$0xff]  ;;  %v754_v43 = vld [vmem:[%s2659_s3 + $0x48] sm:$0xff] }
  0x7f   :  { %1473 = vmatprep.subr.bf16.mxu0 %v1472_v44  ;;  %1497 = vmatprep.subr.bf16.mxu1 %v1596_v55  ;;  %v785_v44 = vld [vmem:[%s2659_s3 + $0x140] sm:$0xff]  ;;  %v1518_v52 = vpack.c.bf16 %v754_v43, %v753_v42 }
  0x80   :  { %v1550_v53 = vpack.c.bf16 %v786_v46, %v785_v44 }
  0x82   :  { %1475 = vmatpush3.bf16.msra.mxu0 %v1474_v54  ;;  %1499 = vmatpush3.bf16.msra.mxu1 %v1498_v56  ;;  %v1520_v54 = vpack.c.bf16 %v772_v49, %v771_v47  ;;  %v755_v56 = vld [vmem:[%s2659_s3 + $0x50] sm:$0xff] }
  0x83   :  { %1501 = vmatprep.subr.bf16.mxu0 %v1500_v57  ;;  %1533 = vmatprep.subr.bf16.mxu1 %v1532_v61  ;;  %v756_v57 = vld [vmem:[%s2659_s3 + $0x58] sm:$0xff]  ;;  %v773_v61 = vld [vmem:[%s2659_s3 + $0xe0] sm:$0xff]  ;;  %v811_v49 = vld [vmem:[%s2659_s3 + $0x210] sm:$0xff] }
  0x84   :  { %v1522_v1 = vpack.c.bf16 %v756_v57, %v755_v56  ;;  %v815_v57 = vld [vmem:[%s2659_s3 + $0x230] sm:$0xff] }
  0x85   :  { %613 = vmatmul.mubr.f32.vlgmr.msra.gmra.mrb[2].mxu0 %v2058_v15  ;;  %1215 = vmatmul.mubr.f32.vlgmr.msra.gmra.mrb[2].mxu1 %v2247_v48  ;;  %v749_v15 = vld [vmem:[%s2659_s3 + $0x20] sm:$0xff]  ;;  %v1540_v48 = vpack.c.bf16 %v798_v13, %v797_v12  ;;  %v807_v12 = vld [vmem:[%s2659_s3 + $0x1f0] sm:$0xff]  ;;  %v1528_v13 = vpack.c.bf16 %v776_v11, %v775_v10 }
  0x86   :  { %1503 = vmatpush3.bf16.msra.mxu0 %v1502_v3  ;;  %1535 = vmatpush3.bf16.msra.mxu1 %v1534_v4  ;;  %v1510_v26 = vpack.c.bf16 %v750_v19, %v749_v15  ;;  %v1524_v3 = vpack.c.bf16 %v774_v62, %v773_v61  ;;  %v1556_v4 = vpack.c.bf16 %v806_v0, %v805_v63  ;;  %v819_v62 = vld [vmem:[%s2659_s3 + $0x250] sm:$0xff]  ;;  %v820_v63 = vld [vmem:[%s2659_s3 + $0x258] sm:$0xff] }
  0x87   :  { %1505 = vmatprep.subr.bf16.mxu0 %v1504_v5  ;;  %1537 = vmatprep.subr.bf16.mxu1 %v1536_v16  ;;  %v757_v5 = vld [vmem:[%s2659_s3 + $0x60] sm:$0xff]  ;;  %v790_v16 = vld [vmem:[%s2659_s3 + $0x168] sm:$0xff]  ;;  %v1580_v0 = vpack.c.bf16 %v820_v63, %v819_v62 }
  0x88   :  { %v1526_v8 = vpack.c.bf16 %v758_v6, %v757_v5  ;;  %v1558_v9 = vpack.c.bf16 %v790_v16, %v789_v7  ;;  %v824_v5 = vld [vmem:[%s2659_s3 + $0x278] sm:$0xff]  ;;  %v718_v6 = vsub.s32 4, %v2577_v23 }
  0x8a   :  { %1507 = vmatpush3.bf16.msra.mxu0 %v1506_v14  ;;  %1539 = vmatpush3.bf16.msra.mxu1 %v1538_v17  ;;  %v808_v14 = vld [vmem:[%s2659_s3 + $0x1f8] sm:$0xff]  ;;  %v759_v17 = vld [vmem:[%s2659_s3 + $0x70] sm:$0xff]  ;;  %v719_v11 = vrot.slane %v2583_v25, %v718_v6 }
  0x8b   :  { %1509 = vmatprep.subr.bf16.mxu0 %v1508_v18  ;;  %1541 = vmatprep.subr.bf16.mxu1 %v1540_v48  ;;  %v760_v18 = vld [vmem:[%s2659_s3 + $0x78] sm:$0xff]  ;;  %v1560_v15 = vpack.c.bf16 %v808_v14, %v807_v12 }
  0x8c   :  { %v1530_v19 = vpack.c.bf16 %v760_v18, %v759_v17  ;;  %v792_v48 = vld [vmem:[%s2659_s3 + $0x178] sm:$0xff] }
  0x8d   :  { %v1562_v21 = vpack.c.bf16 %v792_v48, %v791_v20 }
  0x8e   :  { %1511 = vmatpush3.bf16.msra.mxu0 %v1510_v26  ;;  %1543 = vmatpush3.bf16.msra.mxu1 %v1542_v27  ;;  %v710_v26 = vsub.s32 2, %v2577_v23  ;;  %v706_v27 = vsub.s32 1, %v2577_v23 }
  0x8f   :  { %1513 = vmatprep.subr.bf16.mxu0 %v1512_v28  ;;  %1545 = vmatprep.subr.bf16.mxu1 %v1544_v32  ;;  %v714_v28 = vsub.s32 3, %v2577_v23 }
  0x90   :  { %v711_v30 = vrot.slane %v2583_v25, %v710_v26  ;;  %v707_v31 = vrot.slane %v2583_v25, %v706_v27 }
  0x91   :  { %v715_v32 = vrot.slane %v2583_v25, %v714_v28 }
  0x92   :  { %1515 = vmatpush3.bf16.msra.mxu0 %v1514_v38  ;;  %1547 = vmatpush3.bf16.msra.mxu1 %v1546_v40  ;;  %v810_v38 = vld [vmem:[%s2659_s3 + $0x208] sm:$0xff] }
  0x93   :  { %1517 = vmatprep.subr.bf16.mxu0 %v1516_v41  ;;  %1549 = vmatprep.subr.bf16.mxu1 %v1548_v45  ;;  %v1565_v45 = vpack.c.bf16 %v810_v38, %v809_v37 }
  0x96   :  { %1519 = vmatpush3.bf16.msra.mxu0 %v1518_v52  ;;  %1551 = vmatpush3.bf16.msra.mxu1 %v1550_v53  ;;  %v1568_v52 = vpack.c.bf16 %v812_v50, %v811_v49  ;;  %v813_v53 = vld [vmem:[%s2659_s3 + $0x220] sm:$0xff] }
  0x97   :  { %1521 = vmatprep.subr.bf16.mxu0 %v1520_v54  ;;  %1553 = vmatprep.subr.bf16.mxu1 %v1552_v59  ;;  %v814_v54 = vld [vmem:[%s2659_s3 + $0x228] sm:$0xff]  ;;  %v1574_v59 = vpack.c.bf16 %v816_v58, %v815_v57 }
  0x98   :  { %v1571_v56 = vpack.c.bf16 %v814_v54, %v813_v53 }
  0x9a   :  { %1523 = vmatpush3.bf16.msra.mxu0 %v1522_v1  ;;  %1555 = vmatpush3.bf16.msra.mxu1 %v1554_v2  ;;  %v821_v1 = vld [vmem:[%s2659_s3 + $0x260] sm:$0xff]  ;;  %v822_v2 = vld [vmem:[%s2659_s3 + $0x268] sm:$0xff] }
  0x9b   :  { %1525 = vmatprep.subr.bf16.mxu0 %v1524_v3  ;;  %1557 = vmatprep.subr.bf16.mxu1 %v1556_v4  ;;  %v1583_v3 = vpack.c.bf16 %v822_v2, %v821_v1  ;;  %v823_v4 = vld [vmem:[%s2659_s3 + $0x270] sm:$0xff] }
  0x9e   :  { %1527 = vmatpush3.bf16.msra.mxu0 %v1526_v8  ;;  %1559 = vmatpush3.bf16.msra.mxu1 %v1558_v9  ;;  %v1586_v8 = vpack.c.bf16 %v824_v5, %v823_v4 }
  0x9f   :  { %1529 = vmatprep.subr.bf16.mxu0 %v1528_v13  ;;  %1561 = vmatprep.subr.bf16.mxu1 %v1560_v15 }
  0xa2   :  { %1531 = vmatpush3.bf16.msra.mxu0 %v1530_v19  ;;  %1563 = vmatpush3.bf16.msra.mxu1 %v1562_v21  ;;  %v826_v19 = vstv %s2661_s4 }
  0xa3   :  { %1564 = vmatprep.subr.bf16.mxu0 %v1596_v55 }
 0x138   :  { %v401_v33 = vpop.f32.mrb[0].mxu0  ;;  %v543_v35 = vpop.f32.mrb[0].mxu1 }
 0x139   :  { %v725_v34 = vadd.f32 %v703_v29, %v401_v33  ;;  %v403_v36 = vpop.f32.mrb[1].mxu0  ;;  %v727_v40 = vadd.f32 %v711_v30, %v543_v35  ;;  %v545_v42 = vpop.f32.mrb[1].mxu1 }
 0x13a   :  { %v726_v41 = vadd.f32 %v707_v31, %v403_v36  ;;  %v728_v43 = vadd.f32 %v715_v32, %v545_v42 }
 0x13b   :  { %v730_v46 = vmax.f32 %v725_v34, 0.0  ;;  %v732_v51 = vmax.f32 %v727_v40, 0.0 }
 0x13c   :  { %v731_v44 = vmax.f32 %v726_v41, 0.0  ;;  %v733_v47 = vmax.f32 %v728_v43, 0.0 }
 0x13e   :  { %891 = vmatprep.mubr.f32.mxu0 %v731_v44  ;;  %961 = vmatprep.mubr.f32.mxu1 %v733_v47 }
 0x13f   :  { %892 = vmatmul.mubr.f32.vlgmr.msra.gmra.mrb[4].mxu0 %v730_v46  ;;  %962 = vmatmul.mubr.f32.vlgmr.msra.gmra.mrb[4].mxu1 %v732_v51 }
 0x140   :  { %1566 = vmatpush3.bf16.msra.mxu0 %v1565_v45  ;;  %1249 = vmatprep.mubr.msk.f32.mxu0 %vm1597_vm0, %v1595_v39  ;;  %v817_v39 = vld [vmem:[%s2659_s3 + $0x240] sm:$0xff] }
 0x141   :  { %1567 = vmatprep.subr.bf16.mxu0 %v1596_v55  ;;  %v1577_v61 = vpack.c.bf16 %v818_v60, %v817_v39 }
 0x144   :  { %1569 = vmatpush3.bf16.msra.mxu0 %v1568_v52 }
 0x145   :  { %1570 = vmatprep.subr.bf16.mxu0 %v1596_v55 }
 0x148   :  { %1572 = vmatpush3.bf16.msra.mxu0 %v1571_v56 }
 0x149   :  { %1573 = vmatprep.subr.bf16.mxu0 %v1596_v55 }
 0x14c   :  { %1575 = vmatpush3.bf16.msra.mxu0 %v1574_v59 }
 0x14d   :  { %1576 = vmatprep.subr.bf16.mxu0 %v1596_v55 }
 0x150   :  { %1578 = vmatpush3.bf16.msra.mxu0 %v1577_v61 }
 0x151   :  { %1579 = vmatprep.subr.bf16.mxu0 %v1596_v55 }
 0x154   :  { %1581 = vmatpush3.bf16.msra.mxu0 %v1580_v0 }
 0x155   :  { %1582 = vmatprep.subr.bf16.mxu0 %v1596_v55 }
 0x158   :  { %v1075_v7 = vpop.f32.mrb[2].mxu0  ;;  %1584 = vmatpush3.bf16.msra.mxu0 %v1583_v3  ;;  %v684_v9 = vpop.f32.mrb[2].mxu1 }
 0x159   :  { %v1076_v16 = vpop.f32.mrb[3].mxu0  ;;  %1585 = vmatprep.subr.bf16.mxu0 %v1596_v55  ;;  %v1216_v12 = vpop.f32.mrb[3].mxu1 }
 0x15a   :  { %v1077_v10 = vadd.f32 %v1076_v16, %v1075_v7 }
 0x15c   :  { %v685_v13 = vadd.f32 %v1077_v10, %v684_v9  ;;  %1587 = vmatpush3.bf16.msra.mxu0 %v1586_v8 }
 0x15e   :  { %v729_v14 = vadd.f32 %v719_v11, %v685_v13 }
 0x160   :  { %v734_v17 = vmax.f32 %v729_v14, 0.0 }
 0x162   :  { %1250 = vmatmul.mubr.f32.vlgmr.msra.gmra.mrb[6].mxu0 %v734_v17 }
 0x212   :  { %v1127_v18 = vpop.f32.mrb[4].mxu0  ;;  %v1162_v15 = vpop.f32.mrb[4].mxu1 }
 0x213   :  { %v1128_v20 = vpop.f32.mrb[5].mxu0  ;;  %v1163_v21 = vpop.f32.mrb[5].mxu1 }
 0x214   :  { %v1129_v48 = vadd.f32 %v1128_v20, %v1127_v18  ;;  %v1164_v22 = vadd.f32 %v1163_v21, %v1162_v15 }
 0x216   :  { %v894_v55 = vadd.f32 %v1129_v48, %v826_v19 }
 0x218   :  { %v964_v23 = vadd.f32 %v1164_v22, %v894_v55 }
 0x235   :  { %v1033_v24 = vpop.f32.mrb[6].mxu0 }
 0x236   :  { %v1034_v25 = vadd.f32 %v1033_v24, %v964_v23  ;;  %v1251_v26 = vpop.f32.mrb[7].mxu0 }
 0x238   :  { %1038 = vst.msk [vmem:[%s2662_s5] sm:$0xff] %vm1037_vm1, %v1034_v25 }

</bundles_post_ra>
